<compile_context>
chip_gen: v6e
topology: v6e:2x2x1
jax: 0.10.0
libtpu: 0.0.40
codegen_flags: <defaults>
</compile_context>

<pallas_src>
import functools
import math

import jax
import jax.numpy as jnp
from jax.experimental import pallas as pl
from jax.experimental.pallas import tpu as pltpu

# ---- synthetic bert_model.config (small shapes, deterministic init) ----
VOCAB      = 100
TYPE_VOCAB = 2
MAX_POS    = 16
HIDDEN     = 32          # true hidden size (== embedding_dim)
N_LAYERS   = 2
N_HEADS    = 2
HEAD_DIM   = HIDDEN // N_HEADS
INTER      = 64          # true FFN width
OUT_DIM    = 3           # NLI classes
LN_EPS     = 1e-12

LANE = 128               # TPU lane width
HP   = LANE              # hidden padded lane-dense
IP   = LANE              # FFN intermediate padded lane-dense

_VMEM = pl.BlockSpec(memory_space=pltpu.MemorySpace.VMEM)


# --------------------------- in-kernel helpers ---------------------------
def _masked_layer_norm(x, g, b, valid, true_h, eps=LN_EPS):
    """LayerNorm over the first `true_h` lanes of a lane-padded (M, HP) slab.

    Padded lanes of x are zero; g/b are zero-padded, so the output's padded
    lanes stay exactly zero.
    """
    mean = jnp.sum(x, axis=-1, keepdims=True) / true_h
    d = jnp.where(valid, x - mean, 0.0)
    var = jnp.sum(d * d, axis=-1, keepdims=True) / true_h
    return d * jax.lax.rsqrt(var + eps) * g + b


def _gelu(x):
    # TODO(synk): HF BERT uses exact erf-GELU; tanh approximation used here.
    c = math.sqrt(2.0 / math.pi)
    return 0.5 * x * (1.0 + jnp.tanh(c * (x + 0.044715 * x * x * x)))


# --------------------------- fused encoder layer ---------------------------
def _encoder_layer_kernel(*refs, n_heads, head_dim, input_ln):
    if input_ln:
        (x_ref, mask_ref, iln_g_ref, iln_b_ref,
         wqkv_ref, bqkv_ref, wo_ref, bo_ref, ln1_g_ref, ln1_b_ref,
         wi_ref, bi_ref, wf_ref, bf_ref, ln2_g_ref, ln2_b_ref, o_ref) = refs
    else:
        (x_ref, mask_ref,
         wqkv_ref, bqkv_ref, wo_ref, bo_ref, ln1_g_ref, ln1_b_ref,
         wi_ref, bi_ref, wf_ref, bf_ref, ln2_g_ref, ln2_b_ref, o_ref) = refs
        iln_g_ref = iln_b_ref = None

    H = n_heads * head_dim
    scale = 1.0 / math.sqrt(head_dim)
    b_idx = pl.program_id(0)

    x = x_ref[...].astype(jnp.float32)                         # (S, HP)
    hp = x.shape[-1]
    valid = jax.lax.broadcasted_iota(jnp.int32, (1, hp), 1) < H

    if input_ln:
        # embedding LayerNorm fused into layer 0 (saves a standalone launch)
        x = _masked_layer_norm(x, iln_g_ref[...], iln_b_ref[...], valid, H)

    # additive mask row for this batch element: (1, S)
    m_b = mask_ref[pl.ds(b_idx, 1), :]

    # --- fused QKV projection, bf16 MXU feed / f32 accumulate: (S, 3*HP) ---
    x_bf = x.astype(jnp.bfloat16)
    qkv = jnp.dot(x_bf, wqkv_ref[...],
                  preferred_element_type=jnp.float32) + bqkv_ref[...]
    q = qkv[:, 0 * HP:1 * HP]
    k = qkv[:, 1 * HP:2 * HP]
    v = qkv[:, 2 * HP:3 * HP]

    # --- per-head attention (batch handled by the grid; only n_heads=2 small
    #     head contexts are live, then one lane concat) ---
    head_ctxs = []
    for hi in range(n_heads):
        c0, c1 = hi * head_dim, (hi + 1) * head_dim
        q_h = q[:, c0:c1].astype(jnp.bfloat16)
        k_h = k[:, c0:c1].astype(jnp.bfloat16)
        v_h = v[:, c0:c1].astype(jnp.bfloat16)
        s = jax.lax.dot_general(q_h, k_h, (((1,), (1,)), ((), ())),
                                preferred_element_type=jnp.float32)
        s = s * scale + m_b
        s = s - jnp.max(s, axis=-1, keepdims=True)
        p = jnp.exp(s)
        p = p * pl.reciprocal(jnp.sum(p, axis=-1, keepdims=True), approx=True)
        head_ctxs.append(jnp.dot(p.astype(jnp.bfloat16), v_h,
                                 preferred_element_type=jnp.float32))
    ctx = jnp.concatenate(head_ctxs, axis=-1)                  # (S, H) true width

    # --- output projection + residual + LayerNorm1 ---
    attn_out = jnp.dot(ctx.astype(jnp.bfloat16), wo_ref[...],
                       preferred_element_type=jnp.float32) + bo_ref[...]
    h1 = _masked_layer_norm(attn_out + x, ln1_g_ref[...], ln1_b_ref[...],
                            valid, H)

    # --- FFN (GELU) + residual + LayerNorm2 ---
    inter = _gelu(jnp.dot(h1.astype(jnp.bfloat16), wi_ref[...],
                          preferred_element_type=jnp.float32) + bi_ref[...])
    ffn = jnp.dot(inter.astype(jnp.bfloat16), wf_ref[...],
                  preferred_element_type=jnp.float32) + bf_ref[...]
    h2 = _masked_layer_norm(ffn + h1, ln2_g_ref[...], ln2_b_ref[...], valid, H)

    o_ref[...] = h2.astype(o_ref.dtype)


def encoder_layer(h, add_mask, lp, *, batch, seq, input_ln=False,
                  in_ln_g=None, in_ln_b=None):
    """One full BERT encoder layer in a single pallas_call.

    h: (B*S, HP) lane-padded activations; add_mask: (B, S) additive mask.
    Grid over batch (parallel -> v7x megacore); weights stay block-(0,0)
    resident; activation HBM buffer is reused via input_output_aliases.
    """
    BS, HPc = h.shape
    kern = functools.partial(_encoder_layer_kernel, n_heads=N_HEADS,
                             head_dim=HEAD_DIM, input_ln=input_ln)

    def full_spec(a):
        return pl.BlockSpec(a.shape, lambda b, _nd=a.ndim: (0,) * _nd)

    x_spec = pl.BlockSpec((seq, HPc), lambda b: (b, 0))
    out_spec = pl.BlockSpec((seq, HPc), lambda b: (b, 0))

    args = [h, add_mask]
    specs = [x_spec, full_spec(add_mask)]
    if input_ln:
        args += [in_ln_g, in_ln_b]
        specs += [full_spec(in_ln_g), full_spec(in_ln_b)]
    weights = [lp["wqkv"], lp["bqkv"], lp["wo"], lp["bo"],
               lp["ln1_g"], lp["ln1_b"], lp["wi"], lp["bi"],
               lp["wf"], lp["bf"], lp["ln2_g"], lp["ln2_b"]]
    args += weights
    specs += [full_spec(a) for a in weights]

    # TODO(synk): at real BERT shapes set
    # pltpu.CompilerParams(vmem_limit_bytes=...) per generation (v7x 64 MiB).
    return pl.pallas_call(
        kern,
        out_shape=jax.ShapeDtypeStruct((BS, HPc), jnp.float32),
        grid=(batch,),
        in_specs=specs,
        out_specs=out_spec,
        input_output_aliases={0: 0},
        compiler_params=pltpu.CompilerParams(
            dimension_semantics=("parallel",)),
    )(*args)


# --------------------------- pooler + classifier head ---------------------------
def _pooler_head_kernel(h_ref, pw_ref, pb_ref, w1_ref, b1_ref, w2_ref, b2_ref,
                        o_ref, *, batch, seq):
    # CLS rows (token 0 of each sequence) via a sublane-strided ref read:
    # rows 0, S, 2S, ... -- no wrapper reshape/slice between pallas_calls.
    cls = h_ref[pl.ds(0, batch, stride=seq), :].astype(jnp.bfloat16)   # (B, HP)
    pooled = jnp.tanh(jnp.dot(cls, pw_ref[...],
                              preferred_element_type=jnp.float32) + pb_ref[...])
    hid = jnp.maximum(jnp.dot(pooled.astype(jnp.bfloat16), w1_ref[...],
                              preferred_element_type=jnp.float32) + b1_ref[...],
                      0.0)
    logits = jnp.dot(hid.astype(jnp.bfloat16), w2_ref[...],
                     preferred_element_type=jnp.float32) + b2_ref[...]
    o_ref[...] = logits.astype(o_ref.dtype)                   # (B, LANE) lane-dense


def pooler_and_head(h, params, *, batch, seq):
    """tanh pooler + Linear/ReLU/Linear head fused in one call.

    Takes the full (B*S, HP) activation slab; CLS extraction happens in-kernel.
    Logits land in a lane-dense (B, 128) slab (weights pre-padded at init) and
    are sliced to OUT_DIM outside.
    """
    out = pl.pallas_call(
        functools.partial(_pooler_head_kernel, batch=batch, seq=seq),
        out_shape=jax.ShapeDtypeStruct((batch, LANE), jnp.float32),
        in_specs=[_VMEM] * 7,
        out_specs=_VMEM,
    )(h, params["pool_w"], params["pool_b"],
      params["head_w1"], params["head_b1"],
      params["head_w2"], params["head_b2"])
    return out[:, :OUT_DIM]


# --------------------------- parameters (padded once at init) ---------------------------
def init_params(key):
    def nrm(k, shape):
        return 0.02 * jax.random.normal(k, shape, jnp.float32)

    def pad2(w, rows, cols, dtype=jnp.bfloat16):
        out = jnp.zeros((rows, cols), jnp.float32)
        out = out.at[:w.shape[0], :w.shape[1]].set(w)
        return out.astype(dtype)

    def padrow(v, cols):
        return jnp.zeros((1, cols), jnp.float32).at[0, :v.shape[0]].set(v)

    keys = iter(jax.random.split(key, 64))
    H = HIDDEN
    p = {
        # embedding tables lane-padded so activations are born lane-dense
        "word_emb": pad2(nrm(next(keys), (VOCAB, H)), VOCAB, HP, jnp.float32),
        "pos_emb":  pad2(nrm(next(keys), (MAX_POS, H)), MAX_POS, HP, jnp.float32),
        "type_emb": pad2(nrm(next(keys), (TYPE_VOCAB, H)), TYPE_VOCAB, HP, jnp.float32),
        "emb_ln_g": padrow(jnp.ones((H,), jnp.float32), HP),
        "emb_ln_b": padrow(jnp.zeros((H,), jnp.float32), HP),
        "layers": [],
        # BERT pooler (produces outputs[1]) -- bf16 matmul weights
        "pool_w":  pad2(nrm(next(keys), (H, H)), HP, HP),
        "pool_b":  padrow(jnp.zeros((H,), jnp.float32), HP),
        # self.out = Linear(H,H) -> ReLU -> Linear(H, output_dim)
        "head_w1": pad2(nrm(next(keys), (H, H)), HP, HP),
        "head_b1": padrow(jnp.zeros((H,), jnp.float32), HP),
        "head_w2": pad2(nrm(next(keys), (H, OUT_DIM)), HP, LANE),
        "head_b2": padrow(jnp.zeros((OUT_DIM,), jnp.float32), LANE),
    }
    for _ in range(N_LAYERS):
        wq = nrm(next(keys), (H, H))
        wk = nrm(next(keys), (H, H))
        wv = nrm(next(keys), (H, H))
        wqkv = jnp.zeros((HP, 3 * HP), jnp.float32)
        wqkv = wqkv.at[:H, 0 * HP:0 * HP + H].set(wq)
        wqkv = wqkv.at[:H, 1 * HP:1 * HP + H].set(wk)
        wqkv = wqkv.at[:H, 2 * HP:2 * HP + H].set(wv)
        p["layers"].append({
            "wqkv": wqkv.astype(jnp.bfloat16),                     # (HP, 3*HP)
            "bqkv": jnp.zeros((1, 3 * HP), jnp.float32),
            "wo":   pad2(nrm(next(keys), (H, H)), H, HP),          # (H, HP)
            "bo":   padrow(jnp.zeros((H,), jnp.float32), HP),
            "ln1_g": padrow(jnp.ones((H,), jnp.float32), HP),
            "ln1_b": padrow(jnp.zeros((H,), jnp.float32), HP),
            "wi":   pad2(nrm(next(keys), (H, INTER)), HP, IP),     # (HP, IP)
            "bi":   padrow(jnp.zeros((INTER,), jnp.float32), IP),
            "wf":   pad2(nrm(next(keys), (INTER, H)), IP, HP),     # (IP, HP)
            "bf":   padrow(jnp.zeros((H,), jnp.float32), HP),
            "ln2_g": padrow(jnp.ones((H,), jnp.float32), HP),
            "ln2_b": padrow(jnp.zeros((H,), jnp.float32), HP),
        })
    return p


# --------------------------- forward pass ---------------------------
def bert_nli_forward(params, sequence, attn_mask, token_type):
    B, S = sequence.shape

    # embeddings (gathers are XLA glue; tables are pre-padded -> lane-dense h)
    we = params["word_emb"][sequence]                               # (B,S,HP)
    pe = params["pos_emb"][jnp.arange(S)][None, :, :]               # (1,S,HP)
    te = params["type_emb"][token_type]                             # (B,S,HP)
    h = (we + pe + te).astype(jnp.float32).reshape(B * S, HP)

    # additive attention mask, HF-BERT style: (B, S), 0 keep / -1e4 pad
    add_mask = (1.0 - attn_mask.astype(jnp.float32)) * -10000.0

    # transformer encoder: one fused pallas_call per layer (emb-LN fused into
    # layer 0); activation buffer aliased across layers
    for li, lp in enumerate(params["layers"]):
        h = encoder_layer(h, add_mask, lp, batch=B, seq=S,
                          input_ln=(li == 0),
                          in_ln_g=params["emb_ln_g"],
                          in_ln_b=params["emb_ln_b"])

    # BERT pooler (outputs[1]) + self.out head, one fused call
    logits = pooler_and_head(h, params, batch=B, seq=S)
    return logits                                                   # (B, OUT_DIM)


# --------------------------- driver ---------------------------
if __name__ == "__main__":
    key = jax.random.PRNGKey(0)
    pkey, dkey = jax.random.split(key)
    params = init_params(pkey)

    B, S = 2, 8
    sequence   = jax.random.randint(dkey, (B, S), 0, VOCAB, dtype=jnp.int32)
    attn_mask  = jnp.ones((B, S), jnp.int32).at[1, 6:].set(0)   # pad last 2 tokens of row 1
    token_type = jnp.concatenate(
        [jnp.zeros((B, S // 2), jnp.int32), jnp.ones((B, S // 2), jnp.int32)], axis=1)

    logits = jax.jit(bert_nli_forward)(params, sequence, attn_mask, token_type)
    jax.block_until_ready(logits)
    assert logits.shape == (B, OUT_DIM) and logits.dtype == jnp.float32
    assert bool(jnp.all(jnp.isfinite(logits)))
    print("KERNEL_OK")
</pallas_src>

<mosaic_0001>
module attributes {stable_mosaic.version = 11 : i64} {
  func.func @_pooler_head_kernel(%arg0: memref<16x128xf32, #tpu.memory_space<vmem>>, %arg1: memref<128x128xbf16, #tpu.memory_space<vmem>>, %arg2: memref<1x128xf32, #tpu.memory_space<vmem>>, %arg3: memref<128x128xbf16, #tpu.memory_space<vmem>>, %arg4: memref<1x128xf32, #tpu.memory_space<vmem>>, %arg5: memref<128x128xbf16, #tpu.memory_space<vmem>>, %arg6: memref<1x128xf32, #tpu.memory_space<vmem>>, %arg7: memref<2x128xf32, #tpu.memory_space<vmem>>) attributes {dimension_semantics = [], scalar_prefetch = 0 : i64, scratch_operands = 0 : i64, tpu.core_type = #tpu.core_type<tc>} {
    %c0 = arith.constant 0 : index
    %c0_0 = arith.constant 0 : index
    %0 = tpu.strided_load %arg0[%c0, %c0_0] {strides = array<i32: 8, 1>} : memref<16x128xf32, #tpu.memory_space<vmem>>, vector<2x128xf32>
    %1 = arith.truncf %0 : vector<2x128xf32> to vector<2x128xbf16>
    %c0_1 = arith.constant 0 : index
    %c0_2 = arith.constant 0 : index
    %2 = vector.load %arg1[%c0_1, %c0_2] : memref<128x128xbf16, #tpu.memory_space<vmem>>, vector<128x128xbf16>
    %cst = arith.constant dense<0.000000e+00> : vector<2x128xf32>
    %3 = tpu.matmul %1, %2, %cst {dimension_numbers = #tpu.dot_dimension_numbers<[1], [0], [0], [1], [0, 0, 1, 1], [], []>} : vector<2x128xbf16>, vector<128x128xbf16>, vector<2x128xf32> -> vector<2x128xf32>
    %c0_3 = arith.constant 0 : index
    %c0_4 = arith.constant 0 : index
    %4 = vector.load %arg2[%c0_3, %c0_4] : memref<1x128xf32, #tpu.memory_space<vmem>>, vector<1x128xf32>
    %5 = vector.broadcast %4 : vector<1x128xf32> to vector<2x128xf32>
    %6 = arith.addf %3, %5 : vector<2x128xf32>
    %7 = math.tanh %6 : vector<2x128xf32>
    %8 = arith.truncf %7 : vector<2x128xf32> to vector<2x128xbf16>
    %c0_5 = arith.constant 0 : index
    %c0_6 = arith.constant 0 : index
    %9 = vector.load %arg3[%c0_5, %c0_6] : memref<128x128xbf16, #tpu.memory_space<vmem>>, vector<128x128xbf16>
    %cst_7 = arith.constant dense<0.000000e+00> : vector<2x128xf32>
    %10 = tpu.matmul %8, %9, %cst_7 {dimension_numbers = #tpu.dot_dimension_numbers<[1], [0], [0], [1], [0, 0, 1, 1], [], []>} : vector<2x128xbf16>, vector<128x128xbf16>, vector<2x128xf32> -> vector<2x128xf32>
    %c0_8 = arith.constant 0 : index
    %c0_9 = arith.constant 0 : index
    %11 = vector.load %arg4[%c0_8, %c0_9] : memref<1x128xf32, #tpu.memory_space<vmem>>, vector<1x128xf32>
    %12 = vector.broadcast %11 : vector<1x128xf32> to vector<2x128xf32>
    %13 = arith.addf %10, %12 : vector<2x128xf32>
    %cst_10 = arith.constant 0.000000e+00 : f32
    %14 = vector.broadcast %cst_10 : f32 to vector<2x128xf32>
    %15 = arith.maximumf %13, %14 : vector<2x128xf32>
    %16 = arith.truncf %15 : vector<2x128xf32> to vector<2x128xbf16>
    %c0_11 = arith.constant 0 : index
    %c0_12 = arith.constant 0 : index
    %17 = vector.load %arg5[%c0_11, %c0_12] : memref<128x128xbf16, #tpu.memory_space<vmem>>, vector<128x128xbf16>
    %cst_13 = arith.constant dense<0.000000e+00> : vector<2x128xf32>
    %18 = tpu.matmul %16, %17, %cst_13 {dimension_numbers = #tpu.dot_dimension_numbers<[1], [0], [0], [1], [0, 0, 1, 1], [], []>} : vector<2x128xbf16>, vector<128x128xbf16>, vector<2x128xf32> -> vector<2x128xf32>
    %c0_14 = arith.constant 0 : index
    %c0_15 = arith.constant 0 : index
    %19 = vector.load %arg6[%c0_14, %c0_15] : memref<1x128xf32, #tpu.memory_space<vmem>>, vector<1x128xf32>
    %20 = vector.broadcast %19 : vector<1x128xf32> to vector<2x128xf32>
    %21 = arith.addf %18, %20 : vector<2x128xf32>
    %c0_16 = arith.constant 0 : index
    %c0_17 = arith.constant 0 : index
    %22 = vector.load %arg7[%c0_16, %c0_17] : memref<2x128xf32, #tpu.memory_space<vmem>>, vector<2x128xf32>
    tpu.vector_store %arg7[%c0_16, %c0_17], %21 {strides = array<i32>} : memref<2x128xf32, #tpu.memory_space<vmem>>, vector<2x128xf32>,
    return
  }
}

module attributes {stable_mosaic.version = 11 : i64} {
  func.func @_encoder_layer_kernel(%arg0: i32, %arg1: memref<8x128xf32, #tpu.memory_space<vmem>>, %arg2: memref<2x8xf32, #tpu.memory_space<vmem>>, %arg3: memref<1x128xf32, #tpu.memory_space<vmem>>, %arg4: memref<1x128xf32, #tpu.memory_space<vmem>>, %arg5: memref<128x384xbf16, #tpu.memory_space<vmem>>, %arg6: memref<1x384xf32, #tpu.memory_space<vmem>>, %arg7: memref<32x128xbf16, #tpu.memory_space<vmem>>, %arg8: memref<1x128xf32, #tpu.memory_space<vmem>>, %arg9: memref<1x128xf32, #tpu.memory_space<vmem>>, %arg10: memref<1x128xf32, #tpu.memory_space<vmem>>, %arg11: memref<128x128xbf16, #tpu.memory_space<vmem>>, %arg12: memref<1x128xf32, #tpu.memory_space<vmem>>, %arg13: memref<128x128xbf16, #tpu.memory_space<vmem>>, %arg14: memref<1x128xf32, #tpu.memory_space<vmem>>, %arg15: memref<1x128xf32, #tpu.memory_space<vmem>>, %arg16: memref<1x128xf32, #tpu.memory_space<vmem>>, %arg17: memref<8x128xf32, #tpu.memory_space<vmem>>) attributes {dimension_semantics = [#tpu.dimension_semantics<parallel>], iteration_bounds = array<i64: 2>, scalar_prefetch = 0 : i64, scratch_operands = 0 : i64, tpu.core_type = #tpu.core_type<tc>, window_params = [{transform_indices = @transform_0, window_bounds = array<i64: 8, 128>}, {pipeline_mode = #tpu.pipeline_mode<synchronous>, transform_indices = @transform_1, window_bounds = array<i64: 2, 8>}, {pipeline_mode = #tpu.pipeline_mode<synchronous>, transform_indices = @transform_2, window_bounds = array<i64: 1, 128>}, {pipeline_mode = #tpu.pipeline_mode<synchronous>, transform_indices = @transform_3, window_bounds = array<i64: 1, 128>}, {pipeline_mode = #tpu.pipeline_mode<synchronous>, transform_indices = @transform_4, window_bounds = array<i64: 128, 384>}, {pipeline_mode = #tpu.pipeline_mode<synchronous>, transform_indices = @transform_5, window_bounds = array<i64: 1, 384>}, {pipeline_mode = #tpu.pipeline_mode<synchronous>, transform_indices = @transform_6, window_bounds = array<i64: 32, 128>}, {pipeline_mode = #tpu.pipeline_mode<synchronous>, transform_indices = @transform_7, window_bounds = array<i64: 1, 128>}, {pipeline_mode = #tpu.pipeline_mode<synchronous>, transform_indices = @transform_8, window_bounds = array<i64: 1, 128>}, {pipeline_mode = #tpu.pipeline_mode<synchronous>, transform_indices = @transform_9, window_bounds = array<i64: 1, 128>}, {pipeline_mode = #tpu.pipeline_mode<synchronous>, transform_indices = @transform_10, window_bounds = array<i64: 128, 128>}, {pipeline_mode = #tpu.pipeline_mode<synchronous>, transform_indices = @transform_11, window_bounds = array<i64: 1, 128>}, {pipeline_mode = #tpu.pipeline_mode<synchronous>, transform_indices = @transform_12, window_bounds = array<i64: 128, 128>}, {pipeline_mode = #tpu.pipeline_mode<synchronous>, transform_indices = @transform_13, window_bounds = array<i64: 1, 128>}, {pipeline_mode = #tpu.pipeline_mode<synchronous>, transform_indices = @transform_14, window_bounds = array<i64: 1, 128>}, {pipeline_mode = #tpu.pipeline_mode<synchronous>, transform_indices = @transform_15, window_bounds = array<i64: 1, 128>}, {transform_indices = @transform_16, window_bounds = array<i64: 8, 128>}]} {
    %c0 = arith.constant 0 : index
    %c0_0 = arith.constant 0 : index
    %0 = vector.load %arg1[%c0, %c0_0] : memref<8x128xf32, #tpu.memory_space<vmem>>, vector<8x128xf32>
    %1 = tpu.iota {dimensions = array<i32: 1>} : vector<1x128xi32>
    %c32_i32 = arith.constant 32 : i32
    %2 = vector.broadcast %c32_i32 : i32 to vector<1x128xi32>
    %3 = arith.cmpi slt, %1, %2 : vector<1x128xi32>
    %c0_1 = arith.constant 0 : index
    %c0_2 = arith.constant 0 : index
    %4 = vector.load %arg3[%c0_1, %c0_2] : memref<1x128xf32, #tpu.memory_space<vmem>>, vector<1x128xf32>
    %c0_3 = arith.constant 0 : index
    %c0_4 = arith.constant 0 : index
    %5 = vector.load %arg4[%c0_3, %c0_4] : memref<1x128xf32, #tpu.memory_space<vmem>>, vector<1x128xf32>
    %cst = arith.constant dense<0.000000e+00> : vector<8xf32>
    %6 = vector.multi_reduction <add>, %0, %cst [1] : vector<8x128xf32> to vector<8xf32>
    %7 = vector.shape_cast %6 : vector<8xf32> to vector<8x1xf32>
    %cst_5 = arith.constant 3.200000e+01 : f32
    %8 = vector.broadcast %cst_5 : f32 to vector<8x1xf32>
    %9 = arith.divf %7, %8 : vector<8x1xf32>
    %10 = vector.broadcast %9 : vector<8x1xf32> to vector<8x128xf32>
    %11 = arith.subf %0, %10 : vector<8x128xf32>
    %cst_6 = arith.constant 0.000000e+00 : f32
    %12 = vector.shape_cast %3 : vector<1x128xi1> to vector<1x128xi1>
    %13 = vector.broadcast %12 : vector<1x128xi1> to vector<8x128xi1>
    %14 = vector.broadcast %cst_6 : f32 to vector<8x128xf32>
    %15 = arith.select %13, %11, %14 : vector<8x128xi1>, vector<8x128xf32>
    %16 = arith.mulf %15, %15 : vector<8x128xf32>
    %cst_7 = arith.constant dense<0.000000e+00> : vector<8xf32>
    %17 = vector.multi_reduction <add>, %16, %cst_7 [1] : vector<8x128xf32> to vector<8xf32>
    %18 = vector.shape_cast %17 : vector<8xf32> to vector<8x1xf32>
    %cst_8 = arith.constant 3.200000e+01 : f32
    %19 = vector.broadcast %cst_8 : f32 to vector<8x1xf32>
    %20 = arith.divf %18, %19 : vector<8x1xf32>
    %cst_9 = arith.constant 9.99999996E-13 : f32
    %21 = vector.broadcast %cst_9 : f32 to vector<8x1xf32>
    %22 = arith.addf %20, %21 : vector<8x1xf32>
    %23 = math.rsqrt %22 : vector<8x1xf32>
    %24 = vector.broadcast %23 : vector<8x1xf32> to vector<8x128xf32>
    %25 = arith.mulf %15, %24 : vector<8x128xf32>
    %26 = vector.broadcast %4 : vector<1x128xf32> to vector<8x128xf32>
    %27 = arith.mulf %25, %26 : vector<8x128xf32>
    %28 = vector.broadcast %5 : vector<1x128xf32> to vector<8x128xf32>
    %29 = arith.addf %27, %28 : vector<8x128xf32>
    %30 = arith.index_cast %arg0 : i32 to index
    %c0_10 = arith.constant 0 : index
    %31 = vector.load %arg2[%30, %c0_10] : memref<2x8xf32, #tpu.memory_space<vmem>>, vector<1x8xf32>
    %32 = arith.truncf %29 : vector<8x128xf32> to vector<8x128xbf16>
    %c0_11 = arith.constant 0 : index
    %c0_12 = arith.constant 0 : index
    %33 = vector.load %arg5[%c0_11, %c0_12] : memref<128x384xbf16, #tpu.memory_space<vmem>>, vector<128x384xbf16>
    %cst_13 = arith.constant dense<0.000000e+00> : vector<8x384xf32>
    %34 = tpu.matmul %32, %33, %cst_13 {dimension_numbers = #tpu.dot_dimension_numbers<[1], [0], [0], [1], [0, 0, 1, 1], [], []>} : vector<8x128xbf16>, vector<128x384xbf16>, vector<8x384xf32> -> vector<8x384xf32>
    %c0_14 = arith.constant 0 : index
    %c0_15 = arith.constant 0 : index
    %35 = vector.load %arg6[%c0_14, %c0_15] : memref<1x384xf32, #tpu.memory_space<vmem>>, vector<1x384xf32>
    %36 = vector.broadcast %35 : vector<1x384xf32> to vector<8x384xf32>
    %37 = arith.addf %34, %36 : vector<8x384xf32>
    %38 = vector.extract_strided_slice %37 {offsets = [0, 0], sizes = [8, 128], strides = [1, 1]} : vector<8x384xf32> to vector<8x128xf32>
    %39 = vector.extract_strided_slice %37 {offsets = [0, 128], sizes = [8, 128], strides = [1, 1]} : vector<8x384xf32> to vector<8x128xf32>
    %40 = vector.extract_strided_slice %37 {offsets = [0, 256], sizes = [8, 128], strides = [1, 1]} : vector<8x384xf32> to vector<8x128xf32>
    %41 = vector.extract_strided_slice %38 {offsets = [0, 0], sizes = [8, 16], strides = [1, 1]} : vector<8x128xf32> to vector<8x16xf32>
    %42 = arith.truncf %41 : vector<8x16xf32> to vector<8x16xbf16>
    %43 = vector.extract_strided_slice %39 {offsets = [0, 0], sizes = [8, 16], strides = [1, 1]} : vector<8x128xf32> to vector<8x16xf32>
    %44 = arith.truncf %43 : vector<8x16xf32> to vector<8x16xbf16>
    %45 = vector.extract_strided_slice %40 {offsets = [0, 0], sizes = [8, 16], strides = [1, 1]} : vector<8x128xf32> to vector<8x16xf32>
    %46 = arith.truncf %45 : vector<8x16xf32> to vector<8x16xbf16>
    %cst_16 = arith.constant dense<0.000000e+00> : vector<8x8xf32>
    %47 = tpu.matmul %42, %44, %cst_16 {dimension_numbers = #tpu.dot_dimension_numbers<[1], [1], [0], [0], [0, 0, 1, 0], [], []>} : vector<8x16xbf16>, vector<8x16xbf16>, vector<8x8xf32> -> vector<8x8xf32>
    %cst_17 = arith.constant 2.500000e-01 : f32
    %48 = vector.broadcast %cst_17 : f32 to vector<8x8xf32>
    %49 = arith.mulf %47, %48 : vector<8x8xf32>
    %50 = vector.broadcast %31 : vector<1x8xf32> to vector<8x8xf32>
    %51 = arith.addf %49, %50 : vector<8x8xf32>
    %cst_18 = arith.constant dense<0xFF800000> : vector<8xf32>
    %52 = vector.multi_reduction <maximumf>, %51, %cst_18 [1] : vector<8x8xf32> to vector<8xf32>
    %53 = vector.shape_cast %52 : vector<8xf32> to vector<8x1xf32>
    %54 = vector.broadcast %53 : vector<8x1xf32> to vector<8x8xf32>
    %55 = arith.subf %51, %54 : vector<8x8xf32>
    %56 = math.exp %55 : vector<8x8xf32>
    %cst_19 = arith.constant dense<0.000000e+00> : vector<8xf32>
    %57 = vector.multi_reduction <add>, %56, %cst_19 [1] : vector<8x8xf32> to vector<8xf32>
    %58 = vector.shape_cast %57 : vector<8xf32> to vector<8x1xf32>
    %59 = tpu.reciprocal %58 {approx = true} : vector<8x1xf32> -> vector<8x1xf32>
    %60 = vector.broadcast %59 : vector<8x1xf32> to vector<8x8xf32>
    %61 = arith.mulf %56, %60 : vector<8x8xf32>
    %62 = arith.truncf %61 : vector<8x8xf32> to vector<8x8xbf16>
    %cst_20 = arith.constant dense<0.000000e+00> : vector<8x16xf32>
    %63 = tpu.matmul %62, %46, %cst_20 {dimension_numbers = #tpu.dot_dimension_numbers<[1], [0], [0], [1], [0, 0, 1, 1], [], []>} : vector<8x8xbf16>, vector<8x16xbf16>, vector<8x16xf32> -> vector<8x16xf32>
    %64 = vector.extract_strided_slice %38 {offsets = [0, 16], sizes = [8, 16], strides = [1, 1]} : vector<8x128xf32> to vector<8x16xf32>
    %65 = arith.truncf %64 : vector<8x16xf32> to vector<8x16xbf16>
    %66 = vector.extract_strided_slice %39 {offsets = [0, 16], sizes = [8, 16], strides = [1, 1]} : vector<8x128xf32> to vector<8x16xf32>
    %67 = arith.truncf %66 : vector<8x16xf32> to vector<8x16xbf16>
    %68 = vector.extract_strided_slice %40 {offsets = [0, 16], sizes = [8, 16], strides = [1, 1]} : vector<8x128xf32> to vector<8x16xf32>
    %69 = arith.truncf %68 : vector<8x16xf32> to vector<8x16xbf16>
    %cst_21 = arith.constant dense<0.000000e+00> : vector<8x8xf32>
    %70 = tpu.matmul %65, %67, %cst_21 {dimension_numbers = #tpu.dot_dimension_numbers<[1], [1], [0], [0], [0, 0, 1, 0], [], []>} : vector<8x16xbf16>, vector<8x16xbf16>, vector<8x8xf32> -> vector<8x8xf32>
    %cst_22 = arith.constant 2.500000e-01 : f32
    %71 = vector.broadcast %cst_22 : f32 to vector<8x8xf32>
    %72 = arith.mulf %70, %71 : vector<8x8xf32>
    %73 = vector.broadcast %31 : vector<1x8xf32> to vector<8x8xf32>
    %74 = arith.addf %72, %73 : vector<8x8xf32>
    %cst_23 = arith.constant dense<0xFF800000> : vector<8xf32>
    %75 = vector.multi_reduction <maximumf>, %74, %cst_23 [1] : vector<8x8xf32> to vector<8xf32>
    %76 = vector.shape_cast %75 : vector<8xf32> to vector<8x1xf32>
    %77 = vector.broadcast %76 : vector<8x1xf32> to vector<8x8xf32>
    %78 = arith.subf %74, %77 : vector<8x8xf32>
    %79 = math.exp %78 : vector<8x8xf32>
    %cst_24 = arith.constant dense<0.000000e+00> : vector<8xf32>
    %80 = vector.multi_reduction <add>, %79, %cst_24 [1] : vector<8x8xf32> to vector<8xf32>
    %81 = vector.shape_cast %80 : vector<8xf32> to vector<8x1xf32>
    %82 = tpu.reciprocal %81 {approx = true} : vector<8x1xf32> -> vector<8x1xf32>
    %83 = vector.broadcast %82 : vector<8x1xf32> to vector<8x8xf32>
    %84 = arith.mulf %79, %83 : vector<8x8xf32>
    %85 = arith.truncf %84 : vector<8x8xf32> to vector<8x8xbf16>
    %cst_25 = arith.constant dense<0.000000e+00> : vector<8x16xf32>
    %86 = tpu.matmul %85, %69, %cst_25 {dimension_numbers = #tpu.dot_dimension_numbers<[1], [0], [0], [1], [0, 0, 1, 1], [], []>} : vector<8x8xbf16>, vector<8x16xbf16>, vector<8x16xf32> -> vector<8x16xf32>
    %87 = tpu.concatenate %63, %86 in 1 : vector<8x16xf32>, vector<8x16xf32> -> vector<8x32xf32>
    %88 = arith.truncf %87 : vector<8x32xf32> to vector<8x32xbf16>
    %c0_26 = arith.constant 0 : index
    %c0_27 = arith.constant 0 : index
    %89 = vector.load %arg7[%c0_26, %c0_27] : memref<32x128xbf16, #tpu.memory_space<vmem>>, vector<32x128xbf16>
    %cst_28 = arith.constant dense<0.000000e+00> : vector<8x128xf32>
    %90 = tpu.matmul %88, %89, %cst_28 {dimension_numbers = #tpu.dot_dimension_numbers<[1], [0], [0], [1], [0, 0, 1, 1], [], []>} : vector<8x32xbf16>, vector<32x128xbf16>, vector<8x128xf32> -> vector<8x128xf32>
    %c0_29 = arith.constant 0 : index
    %c0_30 = arith.constant 0 : index
    %91 = vector.load %arg8[%c0_29, %c0_30] : memref<1x128xf32, #tpu.memory_space<vmem>>, vector<1x128xf32>
    %92 = vector.broadcast %91 : vector<1x128xf32> to vector<8x128xf32>
    %93 = arith.addf %90, %92 : vector<8x128xf32>
    %94 = arith.addf %93, %29 : vector<8x128xf32>
    %c0_31 = arith.constant 0 : index
    %c0_32 = arith.constant 0 : index
    %95 = vector.load %arg9[%c0_31, %c0_32] : memref<1x128xf32, #tpu.memory_space<vmem>>, vector<1x128xf32>
    %c0_33 = arith.constant 0 : index
    %c0_34 = arith.constant 0 : index
    %96 = vector.load %arg10[%c0_33, %c0_34] : memref<1x128xf32, #tpu.memory_space<vmem>>, vector<1x128xf32>
    %cst_35 = arith.constant dense<0.000000e+00> : vector<8xf32>
    %97 = vector.multi_reduction <add>, %94, %cst_35 [1] : vector<8x128xf32> to vector<8xf32>
    %98 = vector.shape_cast %97 : vector<8xf32> to vector<8x1xf32>
    %cst_36 = arith.constant 3.200000e+01 : f32
    %99 = vector.broadcast %cst_36 : f32 to vector<8x1xf32>
    %100 = arith.divf %98, %99 : vector<8x1xf32>
    %101 = vector.broadcast %100 : vector<8x1xf32> to vector<8x128xf32>
    %102 = arith.subf %94, %101 : vector<8x128xf32>
    %cst_37 = arith.constant 0.000000e+00 : f32
    %103 = vector.shape_cast %3 : vector<1x128xi1> to vector<1x128xi1>
    %104 = vector.broadcast %103 : vector<1x128xi1> to vector<8x128xi1>
    %105 = vector.broadcast %cst_37 : f32 to vector<8x128xf32>
    %106 = arith.select %104, %102, %105 : vector<8x128xi1>, vector<8x128xf32>
    %107 = arith.mulf %106, %106 : vector<8x128xf32>
    %cst_38 = arith.constant dense<0.000000e+00> : vector<8xf32>
    %108 = vector.multi_reduction <add>, %107, %cst_38 [1] : vector<8x128xf32> to vector<8xf32>
    %109 = vector.shape_cast %108 : vector<8xf32> to vector<8x1xf32>
    %cst_39 = arith.constant 3.200000e+01 : f32
    %110 = vector.broadcast %cst_39 : f32 to vector<8x1xf32>
    %111 = arith.divf %109, %110 : vector<8x1xf32>
    %cst_40 = arith.constant 9.99999996E-13 : f32
    %112 = vector.broadcast %cst_40 : f32 to vector<8x1xf32>
    %113 = arith.addf %111, %112 : vector<8x1xf32>
    %114 = math.rsqrt %113 : vector<8x1xf32>
    %115 = vector.broadcast %114 : vector<8x1xf32> to vector<8x128xf32>
    %116 = arith.mulf %106, %115 : vector<8x128xf32>
    %117 = vector.broadcast %95 : vector<1x128xf32> to vector<8x128xf32>
    %118 = arith.mulf %116, %117 : vector<8x128xf32>
    %119 = vector.broadcast %96 : vector<1x128xf32> to vector<8x128xf32>
    %120 = arith.addf %118, %119 : vector<8x128xf32>
    %121 = arith.truncf %120 : vector<8x128xf32> to vector<8x128xbf16>
    %c0_41 = arith.constant 0 : index
    %c0_42 = arith.constant 0 : index
    %122 = vector.load %arg11[%c0_41, %c0_42] : memref<128x128xbf16, #tpu.memory_space<vmem>>, vector<128x128xbf16>
    %cst_43 = arith.constant dense<0.000000e+00> : vector<8x128xf32>
    %123 = tpu.matmul %121, %122, %cst_43 {dimension_numbers = #tpu.dot_dimension_numbers<[1], [0], [0], [1], [0, 0, 1, 1], [], []>} : vector<8x128xbf16>, vector<128x128xbf16>, vector<8x128xf32> -> vector<8x128xf32>
    %c0_44 = arith.constant 0 : index
    %c0_45 = arith.constant 0 : index
    %124 = vector.load %arg12[%c0_44, %c0_45] : memref<1x128xf32, #tpu.memory_space<vmem>>, vector<1x128xf32>
    %125 = vector.broadcast %124 : vector<1x128xf32> to vector<8x128xf32>
    %126 = arith.addf %123, %125 : vector<8x128xf32>
    %cst_46 = arith.constant 5.000000e-01 : f32
    %127 = vector.broadcast %cst_46 : f32 to vector<8x128xf32>
    %128 = arith.mulf %127, %126 : vector<8x128xf32>
    %cst_47 = arith.constant 4.471500e-02 : f32
    %129 = vector.broadcast %cst_47 : f32 to vector<8x128xf32>
    %130 = arith.mulf %129, %126 : vector<8x128xf32>
    %131 = arith.mulf %130, %126 : vector<8x128xf32>
    %132 = arith.mulf %131, %126 : vector<8x128xf32>
    %133 = arith.addf %126, %132 : vector<8x128xf32>
    %cst_48 = arith.constant 0.797884583 : f32
    %134 = vector.broadcast %cst_48 : f32 to vector<8x128xf32>
    %135 = arith.mulf %134, %133 : vector<8x128xf32>
    %136 = math.tanh %135 : vector<8x128xf32>
    %cst_49 = arith.constant 1.000000e+00 : f32
    %137 = vector.broadcast %cst_49 : f32 to vector<8x128xf32>
    %138 = arith.addf %137, %136 : vector<8x128xf32>
    %139 = arith.mulf %128, %138 : vector<8x128xf32>
    %140 = arith.truncf %139 : vector<8x128xf32> to vector<8x128xbf16>
    %c0_50 = arith.constant 0 : index
    %c0_51 = arith.constant 0 : index
    %141 = vector.load %arg13[%c0_50, %c0_51] : memref<128x128xbf16, #tpu.memory_space<vmem>>, vector<128x128xbf16>
    %cst_52 = arith.constant dense<0.000000e+00> : vector<8x128xf32>
    %142 = tpu.matmul %140, %141, %cst_52 {dimension_numbers = #tpu.dot_dimension_numbers<[1], [0], [0], [1], [0, 0, 1, 1], [], []>} : vector<8x128xbf16>, vector<128x128xbf16>, vector<8x128xf32> -> vector<8x128xf32>
    %c0_53 = arith.constant 0 : index
    %c0_54 = arith.constant 0 : index
    %143 = vector.load %arg14[%c0_53, %c0_54] : memref<1x128xf32, #tpu.memory_space<vmem>>, vector<1x128xf32>
    %144 = vector.broadcast %143 : vector<1x128xf32> to vector<8x128xf32>
    %145 = arith.addf %142, %144 : vector<8x128xf32>
    %146 = arith.addf %145, %120 : vector<8x128xf32>
    %c0_55 = arith.constant 0 : index
    %c0_56 = arith.constant 0 : index
    %147 = vector.load %arg15[%c0_55, %c0_56] : memref<1x128xf32, #tpu.memory_space<vmem>>, vector<1x128xf32>
    %c0_57 = arith.constant 0 : index
    %c0_58 = arith.constant 0 : index
    %148 = vector.load %arg16[%c0_57, %c0_58] : memref<1x128xf32, #tpu.memory_space<vmem>>, vector<1x128xf32>
    %cst_59 = arith.constant dense<0.000000e+00> : vector<8xf32>
    %149 = vector.multi_reduction <add>, %146, %cst_59 [1] : vector<8x128xf32> to vector<8xf32>
    %150 = vector.shape_cast %149 : vector<8xf32> to vector<8x1xf32>
    %cst_60 = arith.constant 3.200000e+01 : f32
    %151 = vector.broadcast %cst_60 : f32 to vector<8x1xf32>
    %152 = arith.divf %150, %151 : vector<8x1xf32>
    %153 = vector.broadcast %152 : vector<8x1xf32> to vector<8x128xf32>
    %154 = arith.subf %146, %153 : vector<8x128xf32>
    %cst_61 = arith.constant 0.000000e+00 : f32
    %155 = vector.shape_cast %3 : vector<1x128xi1> to vector<1x128xi1>
    %156 = vector.broadcast %155 : vector<1x128xi1> to vector<8x128xi1>
    %157 = vector.broadcast %cst_61 : f32 to vector<8x128xf32>
    %158 = arith.select %156, %154, %157 : vector<8x128xi1>, vector<8x128xf32>
    %159 = arith.mulf %158, %158 : vector<8x128xf32>
    %cst_62 = arith.constant dense<0.000000e+00> : vector<8xf32>
    %160 = vector.multi_reduction <add>, %159, %cst_62 [1] : vector<8x128xf32> to vector<8xf32>
    %161 = vector.shape_cast %160 : vector<8xf32> to vector<8x1xf32>
    %cst_63 = arith.constant 3.200000e+01 : f32
    %162 = vector.broadcast %cst_63 : f32 to vector<8x1xf32>
    %163 = arith.divf %161, %162 : vector<8x1xf32>
    %cst_64 = arith.constant 9.99999996E-13 : f32
    %164 = vector.broadcast %cst_64 : f32 to vector<8x1xf32>
    %165 = arith.addf %163, %164 : vector<8x1xf32>
    %166 = math.rsqrt %165 : vector<8x1xf32>
    %167 = vector.broadcast %166 : vector<8x1xf32> to vector<8x128xf32>
    %168 = arith.mulf %158, %167 : vector<8x128xf32>
    %169 = vector.broadcast %147 : vector<1x128xf32> to vector<8x128xf32>
    %170 = arith.mulf %168, %169 : vector<8x128xf32>
    %171 = vector.broadcast %148 : vector<1x128xf32> to vector<8x128xf32>
    %172 = arith.addf %170, %171 : vector<8x128xf32>
    %c0_65 = arith.constant 0 : index
    %c0_66 = arith.constant 0 : index
    %173 = vector.load %arg17[%c0_65, %c0_66] : memref<8x128xf32, #tpu.memory_space<vmem>>, vector<8x128xf32>
    tpu.vector_store %arg17[%c0_65, %c0_66], %172 {strides = array<i32>} : memref<8x128xf32, #tpu.memory_space<vmem>>, vector<8x128xf32>,
    return
  }
  func.func @transform_0(%arg0: i32) -> (i32, i32) {
    %c0_i32 = arith.constant 0 : i32
    %c0_i32_0 = arith.constant 0 : i32
    return %arg0, %c0_i32 : i32, i32
  }
  func.func @transform_1(%arg0: i32) -> (i32, i32) {
    %c0_i32 = arith.constant 0 : i32
    %c0_i32_0 = arith.constant 0 : i32
    %c0_i32_1 = arith.constant 0 : i32
    return %c0_i32, %c0_i32_0 : i32, i32
  }
  func.func @transform_2(%arg0: i32) -> (i32, i32) {
    %c0_i32 = arith.constant 0 : i32
    %c0_i32_0 = arith.constant 0 : i32
    %c0_i32_1 = arith.constant 0 : i32
    return %c0_i32, %c0_i32_0 : i32, i32
  }
  func.func @transform_3(%arg0: i32) -> (i32, i32) {
    %c0_i32 = arith.constant 0 : i32
    %c0_i32_0 = arith.constant 0 : i32
    %c0_i32_1 = arith.constant 0 : i32
    return %c0_i32, %c0_i32_0 : i32, i32
  }
  func.func @transform_4(%arg0: i32) -> (i32, i32) {
    %c0_i32 = arith.constant 0 : i32
    %c0_i32_0 = arith.constant 0 : i32
    %c0_i32_1 = arith.constant 0 : i32
    return %c0_i32, %c0_i32_0 : i32, i32
  }
  func.func @transform_5(%arg0: i32) -> (i32, i32) {
    %c0_i32 = arith.constant 0 : i32
    %c0_i32_0 = arith.constant 0 : i32
    %c0_i32_1 = arith.constant 0 : i32
    return %c0_i32, %c0_i32_0 : i32, i32
  }
  func.func @transform_6(%arg0: i32) -> (i32, i32) {
    %c0_i32 = arith.constant 0 : i32
    %c0_i32_0 = arith.constant 0 : i32
    %c0_i32_1 = arith.constant 0 : i32
    return %c0_i32, %c0_i32_0 : i32, i32
  }
  func.func @transform_7(%arg0: i32) -> (i32, i32) {
    %c0_i32 = arith.constant 0 : i32
    %c0_i32_0 = arith.constant 0 : i32
    %c0_i32_1 = arith.constant 0 : i32
    return %c0_i32, %c0_i32_0 : i32, i32
  }
  func.func @transform_8(%arg0: i32) -> (i32, i32) {
    %c0_i32 = arith.constant 0 : i32
    %c0_i32_0 = arith.constant 0 : i32
    %c0_i32_1 = arith.constant 0 : i32
    return %c0_i32, %c0_i32_0 : i32, i32
  }
  func.func @transform_9(%arg0: i32) -> (i32, i32) {
    %c0_i32 = arith.constant 0 : i32
    %c0_i32_0 = arith.constant 0 : i32
    %c0_i32_1 = arith.constant 0 : i32
    return %c0_i32, %c0_i32_0 : i32, i32
  }
  func.func @transform_10(%arg0: i32) -> (i32, i32) {
    %c0_i32 = arith.constant 0 : i32
    %c0_i32_0 = arith.constant 0 : i32
    %c0_i32_1 = arith.constant 0 : i32
    return %c0_i32, %c0_i32_0 : i32, i32
  }
  func.func @transform_11(%arg0: i32) -> (i32, i32) {
    %c0_i32 = arith.constant 0 : i32
    %c0_i32_0 = arith.constant 0 : i32
    %c0_i32_1 = arith.constant 0 : i32
    return %c0_i32, %c0_i32_0 : i32, i32
  }
  func.func @transform_12(%arg0: i32) -> (i32, i32) {
    %c0_i32 = arith.constant 0 : i32
    %c0_i32_0 = arith.constant 0 : i32
    %c0_i32_1 = arith.constant 0 : i32
    return %c0_i32, %c0_i32_0 : i32, i32
  }
  func.func @transform_13(%arg0: i32) -> (i32, i32) {
    %c0_i32 = arith.constant 0 : i32
    %c0_i32_0 = arith.constant 0 : i32
    %c0_i32_1 = arith.constant 0 : i32
    return %c0_i32, %c0_i32_0 : i32, i32
  }
  func.func @transform_14(%arg0: i32) -> (i32, i32) {
    %c0_i32 = arith.constant 0 : i32
    %c0_i32_0 = arith.constant 0 : i32
    %c0_i32_1 = arith.constant 0 : i32
    return %c0_i32, %c0_i32_0 : i32, i32
  }
  func.func @transform_15(%arg0: i32) -> (i32, i32) {
    %c0_i32 = arith.constant 0 : i32
    %c0_i32_0 = arith.constant 0 : i32
    %c0_i32_1 = arith.constant 0 : i32
    return %c0_i32, %c0_i32_0 : i32, i32
  }
  func.func @transform_16(%arg0: i32) -> (i32, i32) {
    %c0_i32 = arith.constant 0 : i32
    %c0_i32_0 = arith.constant 0 : i32
    return %arg0, %c0_i32 : i32, i32
  }
}

module attributes {stable_mosaic.version = 11 : i64} {
  func.func @_encoder_layer_kernel(%arg0: i32, %arg1: memref<8x128xf32, #tpu.memory_space<vmem>>, %arg2: memref<2x8xf32, #tpu.memory_space<vmem>>, %arg3: memref<128x384xbf16, #tpu.memory_space<vmem>>, %arg4: memref<1x384xf32, #tpu.memory_space<vmem>>, %arg5: memref<32x128xbf16, #tpu.memory_space<vmem>>, %arg6: memref<1x128xf32, #tpu.memory_space<vmem>>, %arg7: memref<1x128xf32, #tpu.memory_space<vmem>>, %arg8: memref<1x128xf32, #tpu.memory_space<vmem>>, %arg9: memref<128x128xbf16, #tpu.memory_space<vmem>>, %arg10: memref<1x128xf32, #tpu.memory_space<vmem>>, %arg11: memref<128x128xbf16, #tpu.memory_space<vmem>>, %arg12: memref<1x128xf32, #tpu.memory_space<vmem>>, %arg13: memref<1x128xf32, #tpu.memory_space<vmem>>, %arg14: memref<1x128xf32, #tpu.memory_space<vmem>>, %arg15: memref<8x128xf32, #tpu.memory_space<vmem>>) attributes {dimension_semantics = [#tpu.dimension_semantics<parallel>], iteration_bounds = array<i64: 2>, scalar_prefetch = 0 : i64, scratch_operands = 0 : i64, tpu.core_type = #tpu.core_type<tc>, window_params = [{transform_indices = @transform_0, window_bounds = array<i64: 8, 128>}, {pipeline_mode = #tpu.pipeline_mode<synchronous>, transform_indices = @transform_1, window_bounds = array<i64: 2, 8>}, {pipeline_mode = #tpu.pipeline_mode<synchronous>, transform_indices = @transform_2, window_bounds = array<i64: 128, 384>}, {pipeline_mode = #tpu.pipeline_mode<synchronous>, transform_indices = @transform_3, window_bounds = array<i64: 1, 384>}, {pipeline_mode = #tpu.pipeline_mode<synchronous>, transform_indices = @transform_4, window_bounds = array<i64: 32, 128>}, {pipeline_mode = #tpu.pipeline_mode<synchronous>, transform_indices = @transform_5, window_bounds = array<i64: 1, 128>}, {pipeline_mode = #tpu.pipeline_mode<synchronous>, transform_indices = @transform_6, window_bounds = array<i64: 1, 128>}, {pipeline_mode = #tpu.pipeline_mode<synchronous>, transform_indices = @transform_7, window_bounds = array<i64: 1, 128>}, {pipeline_mode = #tpu.pipeline_mode<synchronous>, transform_indices = @transform_8, window_bounds = array<i64: 128, 128>}, {pipeline_mode = #tpu.pipeline_mode<synchronous>, transform_indices = @transform_9, window_bounds = array<i64: 1, 128>}, {pipeline_mode = #tpu.pipeline_mode<synchronous>, transform_indices = @transform_10, window_bounds = array<i64: 128, 128>}, {pipeline_mode = #tpu.pipeline_mode<synchronous>, transform_indices = @transform_11, window_bounds = array<i64: 1, 128>}, {pipeline_mode = #tpu.pipeline_mode<synchronous>, transform_indices = @transform_12, window_bounds = array<i64: 1, 128>}, {pipeline_mode = #tpu.pipeline_mode<synchronous>, transform_indices = @transform_13, window_bounds = array<i64: 1, 128>}, {transform_indices = @transform_14, window_bounds = array<i64: 8, 128>}]} {
    %c0 = arith.constant 0 : index
    %c0_0 = arith.constant 0 : index
    %0 = vector.load %arg1[%c0, %c0_0] : memref<8x128xf32, #tpu.memory_space<vmem>>, vector<8x128xf32>
    %1 = tpu.iota {dimensions = array<i32: 1>} : vector<1x128xi32>
    %c32_i32 = arith.constant 32 : i32
    %2 = vector.broadcast %c32_i32 : i32 to vector<1x128xi32>
    %3 = arith.cmpi slt, %1, %2 : vector<1x128xi32>
    %4 = arith.index_cast %arg0 : i32 to index
    %c0_1 = arith.constant 0 : index
    %5 = vector.load %arg2[%4, %c0_1] : memref<2x8xf32, #tpu.memory_space<vmem>>, vector<1x8xf32>
    %6 = arith.truncf %0 : vector<8x128xf32> to vector<8x128xbf16>
    %c0_2 = arith.constant 0 : index
    %c0_3 = arith.constant 0 : index
    %7 = vector.load %arg3[%c0_2, %c0_3] : memref<128x384xbf16, #tpu.memory_space<vmem>>, vector<128x384xbf16>
    %cst = arith.constant dense<0.000000e+00> : vector<8x384xf32>
    %8 = tpu.matmul %6, %7, %cst {dimension_numbers = #tpu.dot_dimension_numbers<[1], [0], [0], [1], [0, 0, 1, 1], [], []>} : vector<8x128xbf16>, vector<128x384xbf16>, vector<8x384xf32> -> vector<8x384xf32>
    %c0_4 = arith.constant 0 : index
    %c0_5 = arith.constant 0 : index
    %9 = vector.load %arg4[%c0_4, %c0_5] : memref<1x384xf32, #tpu.memory_space<vmem>>, vector<1x384xf32>
    %10 = vector.broadcast %9 : vector<1x384xf32> to vector<8x384xf32>
    %11 = arith.addf %8, %10 : vector<8x384xf32>
    %12 = vector.extract_strided_slice %11 {offsets = [0, 0], sizes = [8, 128], strides = [1, 1]} : vector<8x384xf32> to vector<8x128xf32>
    %13 = vector.extract_strided_slice %11 {offsets = [0, 128], sizes = [8, 128], strides = [1, 1]} : vector<8x384xf32> to vector<8x128xf32>
    %14 = vector.extract_strided_slice %11 {offsets = [0, 256], sizes = [8, 128], strides = [1, 1]} : vector<8x384xf32> to vector<8x128xf32>
    %15 = vector.extract_strided_slice %12 {offsets = [0, 0], sizes = [8, 16], strides = [1, 1]} : vector<8x128xf32> to vector<8x16xf32>
    %16 = arith.truncf %15 : vector<8x16xf32> to vector<8x16xbf16>
    %17 = vector.extract_strided_slice %13 {offsets = [0, 0], sizes = [8, 16], strides = [1, 1]} : vector<8x128xf32> to vector<8x16xf32>
    %18 = arith.truncf %17 : vector<8x16xf32> to vector<8x16xbf16>
    %19 = vector.extract_strided_slice %14 {offsets = [0, 0], sizes = [8, 16], strides = [1, 1]} : vector<8x128xf32> to vector<8x16xf32>
    %20 = arith.truncf %19 : vector<8x16xf32> to vector<8x16xbf16>
    %cst_6 = arith.constant dense<0.000000e+00> : vector<8x8xf32>
    %21 = tpu.matmul %16, %18, %cst_6 {dimension_numbers = #tpu.dot_dimension_numbers<[1], [1], [0], [0], [0, 0, 1, 0], [], []>} : vector<8x16xbf16>, vector<8x16xbf16>, vector<8x8xf32> -> vector<8x8xf32>
    %cst_7 = arith.constant 2.500000e-01 : f32
    %22 = vector.broadcast %cst_7 : f32 to vector<8x8xf32>
    %23 = arith.mulf %21, %22 : vector<8x8xf32>
    %24 = vector.broadcast %5 : vector<1x8xf32> to vector<8x8xf32>
    %25 = arith.addf %23, %24 : vector<8x8xf32>
    %cst_8 = arith.constant dense<0xFF800000> : vector<8xf32>
    %26 = vector.multi_reduction <maximumf>, %25, %cst_8 [1] : vector<8x8xf32> to vector<8xf32>
    %27 = vector.shape_cast %26 : vector<8xf32> to vector<8x1xf32>
    %28 = vector.broadcast %27 : vector<8x1xf32> to vector<8x8xf32>
    %29 = arith.subf %25, %28 : vector<8x8xf32>
    %30 = math.exp %29 : vector<8x8xf32>
    %cst_9 = arith.constant dense<0.000000e+00> : vector<8xf32>
    %31 = vector.multi_reduction <add>, %30, %cst_9 [1] : vector<8x8xf32> to vector<8xf32>
    %32 = vector.shape_cast %31 : vector<8xf32> to vector<8x1xf32>
    %33 = tpu.reciprocal %32 {approx = true} : vector<8x1xf32> -> vector<8x1xf32>
    %34 = vector.broadcast %33 : vector<8x1xf32> to vector<8x8xf32>
    %35 = arith.mulf %30, %34 : vector<8x8xf32>
    %36 = arith.truncf %35 : vector<8x8xf32> to vector<8x8xbf16>
    %cst_10 = arith.constant dense<0.000000e+00> : vector<8x16xf32>
    %37 = tpu.matmul %36, %20, %cst_10 {dimension_numbers = #tpu.dot_dimension_numbers<[1], [0], [0], [1], [0, 0, 1, 1], [], []>} : vector<8x8xbf16>, vector<8x16xbf16>, vector<8x16xf32> -> vector<8x16xf32>
    %38 = vector.extract_strided_slice %12 {offsets = [0, 16], sizes = [8, 16], strides = [1, 1]} : vector<8x128xf32> to vector<8x16xf32>
    %39 = arith.truncf %38 : vector<8x16xf32> to vector<8x16xbf16>
    %40 = vector.extract_strided_slice %13 {offsets = [0, 16], sizes = [8, 16], strides = [1, 1]} : vector<8x128xf32> to vector<8x16xf32>
    %41 = arith.truncf %40 : vector<8x16xf32> to vector<8x16xbf16>
    %42 = vector.extract_strided_slice %14 {offsets = [0, 16], sizes = [8, 16], strides = [1, 1]} : vector<8x128xf32> to vector<8x16xf32>
    %43 = arith.truncf %42 : vector<8x16xf32> to vector<8x16xbf16>
    %cst_11 = arith.constant dense<0.000000e+00> : vector<8x8xf32>
    %44 = tpu.matmul %39, %41, %cst_11 {dimension_numbers = #tpu.dot_dimension_numbers<[1], [1], [0], [0], [0, 0, 1, 0], [], []>} : vector<8x16xbf16>, vector<8x16xbf16>, vector<8x8xf32> -> vector<8x8xf32>
    %cst_12 = arith.constant 2.500000e-01 : f32
    %45 = vector.broadcast %cst_12 : f32 to vector<8x8xf32>
    %46 = arith.mulf %44, %45 : vector<8x8xf32>
    %47 = vector.broadcast %5 : vector<1x8xf32> to vector<8x8xf32>
    %48 = arith.addf %46, %47 : vector<8x8xf32>
    %cst_13 = arith.constant dense<0xFF800000> : vector<8xf32>
    %49 = vector.multi_reduction <maximumf>, %48, %cst_13 [1] : vector<8x8xf32> to vector<8xf32>
    %50 = vector.shape_cast %49 : vector<8xf32> to vector<8x1xf32>
    %51 = vector.broadcast %50 : vector<8x1xf32> to vector<8x8xf32>
    %52 = arith.subf %48, %51 : vector<8x8xf32>
    %53 = math.exp %52 : vector<8x8xf32>
    %cst_14 = arith.constant dense<0.000000e+00> : vector<8xf32>
    %54 = vector.multi_reduction <add>, %53, %cst_14 [1] : vector<8x8xf32> to vector<8xf32>
    %55 = vector.shape_cast %54 : vector<8xf32> to vector<8x1xf32>
    %56 = tpu.reciprocal %55 {approx = true} : vector<8x1xf32> -> vector<8x1xf32>
    %57 = vector.broadcast %56 : vector<8x1xf32> to vector<8x8xf32>
    %58 = arith.mulf %53, %57 : vector<8x8xf32>
    %59 = arith.truncf %58 : vector<8x8xf32> to vector<8x8xbf16>
    %cst_15 = arith.constant dense<0.000000e+00> : vector<8x16xf32>
    %60 = tpu.matmul %59, %43, %cst_15 {dimension_numbers = #tpu.dot_dimension_numbers<[1], [0], [0], [1], [0, 0, 1, 1], [], []>} : vector<8x8xbf16>, vector<8x16xbf16>, vector<8x16xf32> -> vector<8x16xf32>
    %61 = tpu.concatenate %37, %60 in 1 : vector<8x16xf32>, vector<8x16xf32> -> vector<8x32xf32>
    %62 = arith.truncf %61 : vector<8x32xf32> to vector<8x32xbf16>
    %c0_16 = arith.constant 0 : index
    %c0_17 = arith.constant 0 : index
    %63 = vector.load %arg5[%c0_16, %c0_17] : memref<32x128xbf16, #tpu.memory_space<vmem>>, vector<32x128xbf16>
    %cst_18 = arith.constant dense<0.000000e+00> : vector<8x128xf32>
    %64 = tpu.matmul %62, %63, %cst_18 {dimension_numbers = #tpu.dot_dimension_numbers<[1], [0], [0], [1], [0, 0, 1, 1], [], []>} : vector<8x32xbf16>, vector<32x128xbf16>, vector<8x128xf32> -> vector<8x128xf32>
    %c0_19 = arith.constant 0 : index
    %c0_20 = arith.constant 0 : index
    %65 = vector.load %arg6[%c0_19, %c0_20] : memref<1x128xf32, #tpu.memory_space<vmem>>, vector<1x128xf32>
    %66 = vector.broadcast %65 : vector<1x128xf32> to vector<8x128xf32>
    %67 = arith.addf %64, %66 : vector<8x128xf32>
    %68 = arith.addf %67, %0 : vector<8x128xf32>
    %c0_21 = arith.constant 0 : index
    %c0_22 = arith.constant 0 : index
    %69 = vector.load %arg7[%c0_21, %c0_22] : memref<1x128xf32, #tpu.memory_space<vmem>>, vector<1x128xf32>
    %c0_23 = arith.constant 0 : index
    %c0_24 = arith.constant 0 : index
    %70 = vector.load %arg8[%c0_23, %c0_24] : memref<1x128xf32, #tpu.memory_space<vmem>>, vector<1x128xf32>
    %cst_25 = arith.constant dense<0.000000e+00> : vector<8xf32>
    %71 = vector.multi_reduction <add>, %68, %cst_25 [1] : vector<8x128xf32> to vector<8xf32>
    %72 = vector.shape_cast %71 : vector<8xf32> to vector<8x1xf32>
    %cst_26 = arith.constant 3.200000e+01 : f32
    %73 = vector.broadcast %cst_26 : f32 to vector<8x1xf32>
    %74 = arith.divf %72, %73 : vector<8x1xf32>
    %75 = vector.broadcast %74 : vector<8x1xf32> to vector<8x128xf32>
    %76 = arith.subf %68, %75 : vector<8x128xf32>
    %cst_27 = arith.constant 0.000000e+00 : f32
    %77 = vector.shape_cast %3 : vector<1x128xi1> to vector<1x128xi1>
    %78 = vector.broadcast %77 : vector<1x128xi1> to vector<8x128xi1>
    %79 = vector.broadcast %cst_27 : f32 to vector<8x128xf32>
    %80 = arith.select %78, %76, %79 : vector<8x128xi1>, vector<8x128xf32>
    %81 = arith.mulf %80, %80 : vector<8x128xf32>
    %cst_28 = arith.constant dense<0.000000e+00> : vector<8xf32>
    %82 = vector.multi_reduction <add>, %81, %cst_28 [1] : vector<8x128xf32> to vector<8xf32>
    %83 = vector.shape_cast %82 : vector<8xf32> to vector<8x1xf32>
    %cst_29 = arith.constant 3.200000e+01 : f32
    %84 = vector.broadcast %cst_29 : f32 to vector<8x1xf32>
    %85 = arith.divf %83, %84 : vector<8x1xf32>
    %cst_30 = arith.constant 9.99999996E-13 : f32
    %86 = vector.broadcast %cst_30 : f32 to vector<8x1xf32>
    %87 = arith.addf %85, %86 : vector<8x1xf32>
    %88 = math.rsqrt %87 : vector<8x1xf32>
    %89 = vector.broadcast %88 : vector<8x1xf32> to vector<8x128xf32>
    %90 = arith.mulf %80, %89 : vector<8x128xf32>
    %91 = vector.broadcast %69 : vector<1x128xf32> to vector<8x128xf32>
    %92 = arith.mulf %90, %91 : vector<8x128xf32>
    %93 = vector.broadcast %70 : vector<1x128xf32> to vector<8x128xf32>
    %94 = arith.addf %92, %93 : vector<8x128xf32>
    %95 = arith.truncf %94 : vector<8x128xf32> to vector<8x128xbf16>
    %c0_31 = arith.constant 0 : index
    %c0_32 = arith.constant 0 : index
    %96 = vector.load %arg9[%c0_31, %c0_32] : memref<128x128xbf16, #tpu.memory_space<vmem>>, vector<128x128xbf16>
    %cst_33 = arith.constant dense<0.000000e+00> : vector<8x128xf32>
    %97 = tpu.matmul %95, %96, %cst_33 {dimension_numbers = #tpu.dot_dimension_numbers<[1], [0], [0], [1], [0, 0, 1, 1], [], []>} : vector<8x128xbf16>, vector<128x128xbf16>, vector<8x128xf32> -> vector<8x128xf32>
    %c0_34 = arith.constant 0 : index
    %c0_35 = arith.constant 0 : index
    %98 = vector.load %arg10[%c0_34, %c0_35] : memref<1x128xf32, #tpu.memory_space<vmem>>, vector<1x128xf32>
    %99 = vector.broadcast %98 : vector<1x128xf32> to vector<8x128xf32>
    %100 = arith.addf %97, %99 : vector<8x128xf32>
    %cst_36 = arith.constant 5.000000e-01 : f32
    %101 = vector.broadcast %cst_36 : f32 to vector<8x128xf32>
    %102 = arith.mulf %101, %100 : vector<8x128xf32>
    %cst_37 = arith.constant 4.471500e-02 : f32
    %103 = vector.broadcast %cst_37 : f32 to vector<8x128xf32>
    %104 = arith.mulf %103, %100 : vector<8x128xf32>
    %105 = arith.mulf %104, %100 : vector<8x128xf32>
    %106 = arith.mulf %105, %100 : vector<8x128xf32>
    %107 = arith.addf %100, %106 : vector<8x128xf32>
    %cst_38 = arith.constant 0.797884583 : f32
    %108 = vector.broadcast %cst_38 : f32 to vector<8x128xf32>
    %109 = arith.mulf %108, %107 : vector<8x128xf32>
    %110 = math.tanh %109 : vector<8x128xf32>
    %cst_39 = arith.constant 1.000000e+00 : f32
    %111 = vector.broadcast %cst_39 : f32 to vector<8x128xf32>
    %112 = arith.addf %111, %110 : vector<8x128xf32>
    %113 = arith.mulf %102, %112 : vector<8x128xf32>
    %114 = arith.truncf %113 : vector<8x128xf32> to vector<8x128xbf16>
    %c0_40 = arith.constant 0 : index
    %c0_41 = arith.constant 0 : index
    %115 = vector.load %arg11[%c0_40, %c0_41] : memref<128x128xbf16, #tpu.memory_space<vmem>>, vector<128x128xbf16>
    %cst_42 = arith.constant dense<0.000000e+00> : vector<8x128xf32>
    %116 = tpu.matmul %114, %115, %cst_42 {dimension_numbers = #tpu.dot_dimension_numbers<[1], [0], [0], [1], [0, 0, 1, 1], [], []>} : vector<8x128xbf16>, vector<128x128xbf16>, vector<8x128xf32> -> vector<8x128xf32>
    %c0_43 = arith.constant 0 : index
    %c0_44 = arith.constant 0 : index
    %117 = vector.load %arg12[%c0_43, %c0_44] : memref<1x128xf32, #tpu.memory_space<vmem>>, vector<1x128xf32>
    %118 = vector.broadcast %117 : vector<1x128xf32> to vector<8x128xf32>
    %119 = arith.addf %116, %118 : vector<8x128xf32>
    %120 = arith.addf %119, %94 : vector<8x128xf32>
    %c0_45 = arith.constant 0 : index
    %c0_46 = arith.constant 0 : index
    %121 = vector.load %arg13[%c0_45, %c0_46] : memref<1x128xf32, #tpu.memory_space<vmem>>, vector<1x128xf32>
    %c0_47 = arith.constant 0 : index
    %c0_48 = arith.constant 0 : index
    %122 = vector.load %arg14[%c0_47, %c0_48] : memref<1x128xf32, #tpu.memory_space<vmem>>, vector<1x128xf32>
    %cst_49 = arith.constant dense<0.000000e+00> : vector<8xf32>
    %123 = vector.multi_reduction <add>, %120, %cst_49 [1] : vector<8x128xf32> to vector<8xf32>
    %124 = vector.shape_cast %123 : vector<8xf32> to vector<8x1xf32>
    %cst_50 = arith.constant 3.200000e+01 : f32
    %125 = vector.broadcast %cst_50 : f32 to vector<8x1xf32>
    %126 = arith.divf %124, %125 : vector<8x1xf32>
    %127 = vector.broadcast %126 : vector<8x1xf32> to vector<8x128xf32>
    %128 = arith.subf %120, %127 : vector<8x128xf32>
    %cst_51 = arith.constant 0.000000e+00 : f32
    %129 = vector.shape_cast %3 : vector<1x128xi1> to vector<1x128xi1>
    %130 = vector.broadcast %129 : vector<1x128xi1> to vector<8x128xi1>
    %131 = vector.broadcast %cst_51 : f32 to vector<8x128xf32>
    %132 = arith.select %130, %128, %131 : vector<8x128xi1>, vector<8x128xf32>
    %133 = arith.mulf %132, %132 : vector<8x128xf32>
    %cst_52 = arith.constant dense<0.000000e+00> : vector<8xf32>
    %134 = vector.multi_reduction <add>, %133, %cst_52 [1] : vector<8x128xf32> to vector<8xf32>
    %135 = vector.shape_cast %134 : vector<8xf32> to vector<8x1xf32>
    %cst_53 = arith.constant 3.200000e+01 : f32
    %136 = vector.broadcast %cst_53 : f32 to vector<8x1xf32>
    %137 = arith.divf %135, %136 : vector<8x1xf32>
    %cst_54 = arith.constant 9.99999996E-13 : f32
    %138 = vector.broadcast %cst_54 : f32 to vector<8x1xf32>
    %139 = arith.addf %137, %138 : vector<8x1xf32>
    %140 = math.rsqrt %139 : vector<8x1xf32>
    %141 = vector.broadcast %140 : vector<8x1xf32> to vector<8x128xf32>
    %142 = arith.mulf %132, %141 : vector<8x128xf32>
    %143 = vector.broadcast %121 : vector<1x128xf32> to vector<8x128xf32>
    %144 = arith.mulf %142, %143 : vector<8x128xf32>
    %145 = vector.broadcast %122 : vector<1x128xf32> to vector<8x128xf32>
    %146 = arith.addf %144, %145 : vector<8x128xf32>
    %c0_55 = arith.constant 0 : index
    %c0_56 = arith.constant 0 : index
    %147 = vector.load %arg15[%c0_55, %c0_56] : memref<8x128xf32, #tpu.memory_space<vmem>>, vector<8x128xf32>
    tpu.vector_store %arg15[%c0_55, %c0_56], %146 {strides = array<i32>} : memref<8x128xf32, #tpu.memory_space<vmem>>, vector<8x128xf32>,
    return
  }
  func.func @transform_0(%arg0: i32) -> (i32, i32) {
    %c0_i32 = arith.constant 0 : i32
    %c0_i32_0 = arith.constant 0 : i32
    return %arg0, %c0_i32 : i32, i32
  }
  func.func @transform_1(%arg0: i32) -> (i32, i32) {
    %c0_i32 = arith.constant 0 : i32
    %c0_i32_0 = arith.constant 0 : i32
    %c0_i32_1 = arith.constant 0 : i32
    return %c0_i32, %c0_i32_0 : i32, i32
  }
  func.func @transform_2(%arg0: i32) -> (i32, i32) {
    %c0_i32 = arith.constant 0 : i32
    %c0_i32_0 = arith.constant 0 : i32
    %c0_i32_1 = arith.constant 0 : i32
    return %c0_i32, %c0_i32_0 : i32, i32
  }
  func.func @transform_3(%arg0: i32) -> (i32, i32) {
    %c0_i32 = arith.constant 0 : i32
    %c0_i32_0 = arith.constant 0 : i32
    %c0_i32_1 = arith.constant 0 : i32
    return %c0_i32, %c0_i32_0 : i32, i32
  }
  func.func @transform_4(%arg0: i32) -> (i32, i32) {
    %c0_i32 = arith.constant 0 : i32
    %c0_i32_0 = arith.constant 0 : i32
    %c0_i32_1 = arith.constant 0 : i32
    return %c0_i32, %c0_i32_0 : i32, i32
  }
  func.func @transform_5(%arg0: i32) -> (i32, i32) {
    %c0_i32 = arith.constant 0 : i32
    %c0_i32_0 = arith.constant 0 : i32
    %c0_i32_1 = arith.constant 0 : i32
    return %c0_i32, %c0_i32_0 : i32, i32
  }
  func.func @transform_6(%arg0: i32) -> (i32, i32) {
    %c0_i32 = arith.constant 0 : i32
    %c0_i32_0 = arith.constant 0 : i32
    %c0_i32_1 = arith.constant 0 : i32
    return %c0_i32, %c0_i32_0 : i32, i32
  }
  func.func @transform_7(%arg0: i32) -> (i32, i32) {
    %c0_i32 = arith.constant 0 : i32
    %c0_i32_0 = arith.constant 0 : i32
    %c0_i32_1 = arith.constant 0 : i32
    return %c0_i32, %c0_i32_0 : i32, i32
  }
  func.func @transform_8(%arg0: i32) -> (i32, i32) {
    %c0_i32 = arith.constant 0 : i32
    %c0_i32_0 = arith.constant 0 : i32
    %c0_i32_1 = arith.constant 0 : i32
    return %c0_i32, %c0_i32_0 : i32, i32
  }
  func.func @transform_9(%arg0: i32) -> (i32, i32) {
    %c0_i32 = arith.constant 0 : i32
    %c0_i32_0 = arith.constant 0 : i32
    %c0_i32_1 = arith.constant 0 : i32
    return %c0_i32, %c0_i32_0 : i32, i32
  }
  func.func @transform_10(%arg0: i32) -> (i32, i32) {
    %c0_i32 = arith.constant 0 : i32
    %c0_i32_0 = arith.constant 0 : i32
    %c0_i32_1 = arith.constant 0 : i32
    return %c0_i32, %c0_i32_0 : i32, i32
  }
  func.func @transform_11(%arg0: i32) -> (i32, i32) {
    %c0_i32 = arith.constant 0 : i32
    %c0_i32_0 = arith.constant 0 : i32
    %c0_i32_1 = arith.constant 0 : i32
    return %c0_i32, %c0_i32_0 : i32, i32
  }
  func.func @transform_12(%arg0: i32) -> (i32, i32) {
    %c0_i32 = arith.constant 0 : i32
    %c0_i32_0 = arith.constant 0 : i32
    %c0_i32_1 = arith.constant 0 : i32
    return %c0_i32, %c0_i32_0 : i32, i32
  }
  func.func @transform_13(%arg0: i32) -> (i32, i32) {
    %c0_i32 = arith.constant 0 : i32
    %c0_i32_0 = arith.constant 0 : i32
    %c0_i32_1 = arith.constant 0 : i32
    return %c0_i32, %c0_i32_0 : i32, i32
  }
  func.func @transform_14(%arg0: i32) -> (i32, i32) {
    %c0_i32 = arith.constant 0 : i32
    %c0_i32_0 = arith.constant 0 : i32
    return %arg0, %c0_i32 : i32, i32
  }
}

</mosaic_0001>

<bundles_post_ra>
// kernel: bert_nli_forward.5
= control target key start
LH: loop header
LB: loop body
LE: loop exit
PB: predicated region body
PF: predicated region fallthrough
CT: control target
= control target key end

     0   :  { %v547_v1 = vmov 0.0   ;;  %vm548_vm0 = vmmov 0   ;;  %s707_s0 = inlined_call_operand.vmem [shape: f32[16,128], index: 0, kind: input, shape index: {}]   ;;  %s708_s1 = inlined_call_operand.vmem [shape: bf16[128,128], index: 1, kind: input, shape index: {}]   ;;  %s709_s2 = inlined_call_operand.vmem [shape: f32[1,128], index: 2, kind: input, shape index: {}]   ;;  %s710_s3 = inlined_call_operand.vmem [shape: bf16[128,128], index: 3, kind: input, shape index: {}]   ;;  %s711_s4 = inlined_call_operand.vmem [shape: f32[1,128], index: 4, kind: input, shape index: {}]   ;;  %s712_s5 = inlined_call_operand.vmem [shape: bf16[128,128], index: 5, kind: input, shape index: {}]   ;;  %s713_s6 = inlined_call_operand.vmem [shape: f32[1,128], index: 6, kind: input, shape index: {}]   ;;  %s714_s7 = inlined_call_operand.hbm [shape: f32[2,128], index: 7, kind: output, shape index: {}]  }
   0x1   :  { %v499_v0 = vld [vmem:[%s708_s1 + $0x38] sm:$0xff]   ;;  %436 = vmatprep.subr.bf16.mxu0 %v547_v1  ;;  %456 = vmatprep.subr.bf16.mxu1 %v547_v1  ;;  %v500_v2 = vld [vmem:[%s708_s1 + $0x30] sm:$0xff]   ;;  %v501_v3 = vld [vmem:[%s708_s1 + $0x28] sm:$0xff]  }
   0x2   :  { %437 = vmatpush3.bf16.msra.mxu0 %v499_v0  ;;  %452 = vmatprep.mubr.msk.bf16.mxu0 %vm548_vm0, %v547_v1  ;;  %v502_v4 = vld [vmem:[%s708_s1 + $0x20] sm:$0xff]   ;;  %v507_v5 = vld [vmem:[%s710_s3 + $0x38] sm:$0xff]   ;;  %v508_v6 = vld [vmem:[%s710_s3 + $0x30] sm:$0xff]  }
   0x3   :  { %438 = vmatprep.subr.bf16.mxu0 %v547_v1  ;;  %472 = vmatprep.mubr.msk.bf16.mxu1 %vm548_vm0, %v547_v1  ;;  %v503_v7 = vld [vmem:[%s708_s1 + $0x18] sm:$0xff]   ;;  %v509_v8 = vld [vmem:[%s710_s3 + $0x28] sm:$0xff]   ;;  %v504_v9 = vld [vmem:[%s708_s1 + $0x10] sm:$0xff]  }
   0x4   :  { %457 = vmatpush3.bf16.msra.mxu1 %v507_v5 }
   0x5   :  { %458 = vmatprep.subr.bf16.mxu1 %v547_v1 }
   0x6   :  { %439 = vmatpush3.bf16.msra.mxu0 %v500_v2 }
   0x7   :  { %440 = vmatprep.subr.bf16.mxu0 %v547_v1 }
   0x8   :  { %459 = vmatpush3.bf16.msra.mxu1 %v508_v6 }
   0x9   :  { %460 = vmatprep.subr.bf16.mxu1 %v547_v1 }
   0xa   :  { %441 = vmatpush3.bf16.msra.mxu0 %v501_v3 }
   0xb   :  { %442 = vmatprep.subr.bf16.mxu0 %v547_v1 }
   0xc   :  { %461 = vmatpush3.bf16.msra.mxu1 %v509_v8 }
   0xd   :  { %462 = vmatprep.subr.bf16.mxu1 %v547_v1 }
   0xe   :  { %443 = vmatpush3.bf16.msra.mxu0 %v502_v4 }
   0xf   :  { %444 = vmatprep.subr.bf16.mxu0 %v547_v1 }
  0x12   :  { %445 = vmatpush3.bf16.msra.mxu0 %v503_v7 }
  0x13   :  { %446 = vmatprep.subr.bf16.mxu0 %v547_v1 }
  0x14   :  { %12 = vsyncpa [#allocation3], 0  ;;  %v505_v10 = vld [vmem:[%s708_s1 + $0x8] sm:$0xff]   ;;  %v506_v11 = vld [vmem:[%s708_s1] sm:$0xff]   ;;  %s549_s28 = smov [#allocation2]  }
  0x15   :  { %v28_v12 = vld [vmem:[%s707_s0] ss:$8 sm:$0x3]  ;;  %v511_v15 = vld [vmem:[%s710_s3 + $0x18] sm:$0xff]   ;;  %v512_v16 = vld [vmem:[%s710_s3 + $0x10] sm:$0xff]   ;;  %s374_s29 = sshll.u32 %s549_s28, 4  ;;  %s375_s29 = int_to_ptr.vmem [resolvable:$true] %s374_s29 }
  0x16   :  { %447 = vmatpush3.bf16.msra.mxu0 %v504_v9  ;;  %v29_v13 = vpack.c.bf16 %v28_v12, %v28_v12  ;;  %v510_v14 = vld [vmem:[%s710_s3 + $0x20] sm:$0xff]   ;;  %v513_v17 = vld [vmem:[%s710_s3 + $0x8] sm:$0xff]   ;;  %v515_v19 = vld [vmem:[%s712_s5 + $0x38] sm:$0xff]   ;;  %p530_p1 = scmp.lt.s32.totalorder %s375_s29, %s375_s29 }
  0x17   :  { %448 = vmatprep.subr.bf16.mxu0 %v547_v1  ;;  %463 = vmatpush3.bf16.msra.mxu1 %v510_v14  ;;  %v514_v18 = vld [vmem:[%s710_s3] sm:$0xff]   ;;  %v516_v20 = vld [vmem:[%s712_s5 + $0x30] sm:$0xff]   ;;  %v517_v21 = vld [vmem:[%s712_s5 + $0x28] sm:$0xff]  }
  0x18   :  { %464 = vmatprep.subr.bf16.mxu1 %v547_v1  ;;  %v518_v22 = vld [vmem:[%s712_s5 + $0x20] sm:$0xff]   ;;  %v519_v23 = vld [vmem:[%s712_s5 + $0x18] sm:$0xff]   ;;  %v520_v24 = vld [vmem:[%s712_s5 + $0x10] sm:$0xff]  }
  0x19   :  { %v382_v25 = vld [vmem:[%s709_s2] ss:$0 sm:$0xff]  ;;  %v521_v33 = vld [vmem:[%s712_s5 + $0x8] sm:$0xff]  }
  0x1a   :  { %449 = vmatpush3.bf16.msra.mxu0 %v505_v10  ;;  %v522_v34 = vld [vmem:[%s712_s5] sm:$0xff]  }
  0x1b   :  { %450 = vmatprep.subr.bf16.mxu0 %v547_v1  ;;  %465 = vmatpush3.bf16.msra.mxu1 %v511_v15  ;;  %v391_v35 = vld [vmem:[%s711_s4] ss:$0 sm:$0xff]  ;;  %s525_s4 = scalar_lea.vmem %s375_s29, 32 }
  0x1c   :  { %466 = vmatprep.subr.bf16.mxu1 %v547_v1  ;;  %v400_v43 = vld [vmem:[%s713_s6] ss:$0 sm:$0xff]  ;;  %p526_p0 = scmp.ne.s32.totalorder %s375_s29, %s525_s4  ;;  %p531_p2 = scmp.lt.s32.totalorder %s525_s4, %s525_s4 }
  0x1e   :  { %451 = vmatpush3.bf16.msra.mxu0 %v506_v11  ;;  %p532_p3 = por %p531_p2, %p530_p1 }
  0x1f   :  { %476 = vmatprep.subr.bf16.mxu0 %v547_v1  ;;  %467 = vmatpush3.bf16.msra.mxu1 %v512_v16 }
  0x20   :  { %468 = vmatprep.subr.bf16.mxu1 %v547_v1  ;;  %p533_p4 = pnand %p532_p3, %p526_p0 }
  0x21   :  { %453 = vmatmul.mubr.bf16.vlgmr.msra.gmra.mxu0 %v29_v13 }
  0x22   :  { %492 = vmatprep.mubr.msk.bf16.mxu0 %vm548_vm0, %v547_v1  ;;  %477 = vmatpush3.bf16.msra.mxu0 %v515_v19 }
  0x23   :  { %469 = vmatpush3.bf16.msra.mxu1 %v513_v17  ;;  %478 = vmatprep.subr.bf16.mxu0 %v547_v1 }
  0x24   :  { %470 = vmatprep.subr.bf16.mxu1 %v547_v1 }
  0x26   :  { %479 = vmatpush3.bf16.msra.mxu0 %v516_v20 }
  0x27   :  { %471 = vmatpush3.bf16.msra.mxu1 %v514_v18  ;;  %480 = vmatprep.subr.bf16.mxu0 %v547_v1 }
  0x2a   :  { %481 = vmatpush3.bf16.msra.mxu0 %v517_v21 }
  0x2b   :  { %482 = vmatprep.subr.bf16.mxu0 %v547_v1 }
  0x2e   :  { %483 = vmatpush3.bf16.msra.mxu0 %v518_v22 }
  0x2f   :  { %484 = vmatprep.subr.bf16.mxu0 %v547_v1 }
  0x32   :  { %485 = vmatpush3.bf16.msra.mxu0 %v519_v23 }
  0x33   :  { %486 = vmatprep.subr.bf16.mxu0 %v547_v1 }
  0x36   :  { %487 = vmatpush3.bf16.msra.mxu0 %v520_v24 }
  0x37   :  { %488 = vmatprep.subr.bf16.mxu0 %v547_v1 }
  0x3a   :  { %489 = vmatpush3.bf16.msra.mxu0 %v521_v33 }
  0x3b   :  { %490 = vmatprep.subr.bf16.mxu0 %v547_v1 }
  0x3e   :  { %491 = vmatpush3.bf16.msra.mxu0 %v522_v34 }
  0xe1   :  { %v135_v26 = vpop.f32.mrf.mxu0 }
  0xe2   :  { %v136_v27 = vadd.f32 %v382_v25, %v135_v26 }
  0xe3   :  { %v454_v28 = vpop.f32.mrf.mxu0 }
  0xe4   :  { %523 = vtanh.f32 %v136_v27 }
  0xe5   :  { %v138_v29 = vpop.f32.mrf.mxu0 }
  0xe7   :  { %v455_v30 = vpop.f32.mrf.mxu0 }
  0xf1   :  { %v524_v31 = vpop.eup %523 }
  0xf2   :  { %v142_v32 = vpack.c.bf16 %v524_v31, %v524_v31 }
  0xf4   :  { %473 = vmatmul.mubr.bf16.vlgmr.msra.gmra.mxu1 %v142_v32 }
 0x1b4   :  { %v248_v36 = vpop.f32.mrf.mxu1 }
 0x1b5   :  { %v249_v37 = vadd.f32 %v391_v35, %v248_v36 }
 0x1b6   :  { %v474_v38 = vpop.f32.mrf.mxu1 }
 0x1b7   :  { %v254_v39 = vmax.f32 %v249_v37, 0.0 }
 0x1b8   :  { %v251_v40 = vpop.f32.mrf.mxu1 }
 0x1b9   :  { %v255_v41 = vpack.c.bf16 %v254_v39, %v254_v39 }
 0x1ba   :  { %v475_v42 = vpop.f32.mrf.mxu1 }
 0x1bb   :  { %493 = vmatmul.mubr.bf16.vlgmr.msra.gmra.mxu0 %v255_v41 }
 0x27b   :  { %v361_v44 = vpop.f32.mrf.mxu0 }
 0x27c   :  { %v362_v45 = vadd.f32 %v400_v43, %v361_v44 }
 0x27d   :  { %v494_v46 = vpop.f32.mrf.mxu0 }
 0x27e   :  { %367 = vst [vmem:[#allocation2] sm:$0x3] %v362_v45 }
 0x27f   :  { %v364_v47 = vpop.f32.mrf.mxu0 }
 0x280   :  { %536 = shalt.err (!%p533_p4)
}
 0x281   :  { %377 = dma.vmem_to_hbm [thread:$0]  %s375_s29, 32, %s714_s7, [#allocation3]   ;;  %v495_v48 = vpop.f32.mrf.mxu0 }
 0x282   :  { %545 = dma.done.wait [#allocation3], 32  }
 0x283   :  { %546 = vsyncadd [#allocation3], 4294967264 }
 0x284   :  { %381 = vsyncpa [#allocation3], 1 }

// kernel: bert_nli_forward.4
= control target key start
LH: loop header
LB: loop body
LE: loop exit
PB: predicated region body
PF: predicated region fallthrough
CT: control target
= control target key end

     0   :  { %s1741_s29 = smov 0   ;;  %s2009_s0 = inlined_call_operand.vmem [shape: f32[16,128], index: 0, kind: input, shape index: {}, may-alias: {0,14}]   ;;  %s2010_s1 = inlined_call_operand.vmem [shape: f32[2,8], index: 1, kind: input, shape index: {}]   ;;  %s2011_s2 = inlined_call_operand.vmem [shape: bf16[128,384], index: 2, kind: input, shape index: {}]   ;;  %s2012_s3 = inlined_call_operand.vmem [shape: f32[1,384], index: 3, kind: input, shape index: {}]   ;;  %s2013_s4 = inlined_call_operand.vmem [shape: bf16[32,128], index: 4, kind: input, shape index: {}]   ;;  %s2014_s5 = inlined_call_operand.vmem [shape: f32[1,128], index: 5, kind: input, shape index: {}]   ;;  %s2015_s6 = inlined_call_operand.vmem [shape: f32[1,128], index: 6, kind: input, shape index: {}]   ;;  %s2016_s7 = inlined_call_operand.vmem [shape: f32[1,128], index: 7, kind: input, shape index: {}]   ;;  %s2017_s8 = inlined_call_operand.vmem [shape: bf16[128,128], index: 8, kind: input, shape index: {}]   ;;  %s2018_s9 = inlined_call_operand.vmem [shape: f32[1,128], index: 9, kind: input, shape index: {}]   ;;  %s2019_s10 = inlined_call_operand.vmem [shape: bf16[128,128], index: 10, kind: input, shape index: {}]   ;;  %s2020_s11 = inlined_call_operand.vmem [shape: f32[1,128], index: 11, kind: input, shape index: {}]   ;;  %s2021_s12 = inlined_call_operand.vmem [shape: f32[1,128], index: 12, kind: input, shape index: {}]   ;;  %s2022_s13 = inlined_call_operand.vmem [shape: f32[1,128], index: 13, kind: input, shape index: {}]   ;;  %s2023_s14 = inlined_call_operand.vmem [shape: f32[16,128], index: 14, kind: output, shape index: {}, may-alias: {0,14}]  }
   0x1 LB: > { %s1747_s30 = sadd.s32 4294967295, %s1659_s29   ;;  %p1386_p0 = scmp.ge.s32.totalorder %s1659_s29, 1  ;;  %s1659_s29 = sphi %s1741_s29, %s24_s29  }
   0x2   : > { %p411_p1 = scmp.lt.s32.totalorder %s1659_s29, 3 }
   0x4   : > { %p412_p2 = pnand %p1386_p0, %p411_p1 }
   0x5   : > { %p455_p3 = scmp.lt.s32.totalorder (!%p412_p2), %s1747_s30, 1  ;;  %s1664_s15 = smov (!%p412_p2), 112  }
   0x6   : > { %415 = sbr.rel (%p412_p2) target bundleno = 2424 (0x978), region = 76  ;;  %s468_s24 = scalar_lea.vmem (!%p412_p2), %s2010_s1, %s1747_s30 }
   0x7   : > { %s1665_s28 = smov (!%p412_p2), 16  }
   0xb   : > { %v1589_v0 = vld [vmem:[%s2011_s2 + $0xac] ss:$12 sps:$4 sm:$0xff]   ;;  %v1591_v1 = vld [vmem:[%s2011_s2 + $0xa8] ss:$12 sps:$4 sm:$0xff]   ;;  %v1661_v2 = vmov 0   ;;  %s1768_s25 = scalar_select %p455_p3, %s1747_s30, 1  ;;  %v465_v20 = vlaneseq }
   0xc   : > { %680 = vmatprep.mubr.bf16.mxu0 %v1661_v2  ;;  %648 = vmatprep.subr.bf16.mxu0 %v1589_v0  ;;  %v1592_v3 = vld [vmem:[%s2011_s2 + $0x94] ss:$12 sps:$4 sm:$0xff]   ;;  %v1594_v4 = vld [vmem:[%s2011_s2 + $0x90] ss:$12 sps:$4 sm:$0xff]   ;;  %v1597_v6 = vld [vmem:[%s2011_s2 + $0x78] ss:$12 sps:$4 sm:$0xff]  }
   0xd   : > { %649 = vmatpush1.bf16.msra.mxu0 %v1591_v1  ;;  %v1595_v5 = vld [vmem:[%s2011_s2 + $0x7c] ss:$12 sps:$4 sm:$0xff]   ;;  %v1598_v7 = vld [vmem:[%s2011_s2 + $0x64] ss:$12 sps:$4 sm:$0xff]   ;;  %v1600_v8 = vld [vmem:[%s2011_s2 + $0x60] ss:$12 sps:$4 sm:$0xff]  }
   0xe   : > { %650 = vmatprep.subr.bf16.mxu0 %v1592_v3  ;;  %s1387_s18 = sshll.u32 %s1768_s25, 3  ;;  %v1601_v9 = vld [vmem:[%s2011_s2 + $0x4c] ss:$12 sps:$4 sm:$0xff]   ;;  %v1603_v10 = vld [vmem:[%s2011_s2 + $0x48] ss:$12 sps:$4 sm:$0xff]   ;;  %v1662_v19 = vmov 0.0  }
   0xf   : > { %v1604_v11 = vld [vmem:[%s2011_s2 + $0x34] ss:$12 sps:$4 sm:$0xff]   ;;  %v1606_v12 = vld [vmem:[%s2011_s2 + $0x30] ss:$12 sps:$4 sm:$0xff]   ;;  %v1609_v14 = vld [vmem:[%s2011_s2 + $0x18] ss:$12 sps:$4 sm:$0xff]   ;;  %s458_s23 = scalar_lea.vmem %s2009_s0, %s1387_s18  ;;  %1484 = vmatprep.subr.bf16.mxu1 %v1662_v19 }
  0x10   : > { %v1607_v13 = vld [vmem:[%s2011_s2 + $0x1c] ss:$12 sps:$4 sm:$0xff]   ;;  %v1610_v15 = vld [vmem:[%s2011_s2 + $0x4] ss:$12 sps:$4 sm:$0xff]   ;;  %v1612_v16 = vld [vmem:[%s2011_s2] ss:$12 sps:$4 sm:$0xff]  }
  0x11   : > { %651 = vmatpush1.bf16.msra.mxu0 %v1594_v4  ;;  %v1809_v17 = vld [vmem:[%s458_s23] sm:$0xff]  ;;  %vm1663_vm0 = vmmov 0   ;;  %v1820_v21 = vshrl.u32 %v465_v20, 7  ;;  %vm732_vm1 = vcmask 130048   ;;  %v1613_v36 = vld [vmem:[%s2011_s2 + $0xb0] ss:$12 sps:$4 sm:$0xff]  }
  0x12   : > { %652 = vmatprep.subr.bf16.mxu0 %v1595_v5  ;;  %v470_v18 = vpack.c.bf16 %v1809_v17, %v1809_v17  ;;  %1500 = vmatprep.mubr.msk.bf16.mxu1 %vm1663_vm0, %v1662_v19  ;;  %v1827_v24 = vld [vmem:[%s2012_s3] sm:$0x7]  ;;  %v1614_v37 = vld [vmem:[%s2011_s2 + $0x98] ss:$12 sps:$4 sm:$0xff]   ;;  %v1616_v39 = vld [vmem:[%s2011_s2 + $0x68] ss:$12 sps:$4 sm:$0xff]  }
  0x13   : > { %v511_v22 = vsub.s32 1, %v1820_v21  ;;  %v507_v23 = vsub.s32 0, %v1820_v21  ;;  %1485 = vmatpush3.bf16.msra.mxu1 %v1613_v36  ;;  %v1615_v38 = vld [vmem:[%s2011_s2 + $0x80] ss:$12 sps:$4 sm:$0xff]   ;;  %v1617_v40 = vld [vmem:[%s2011_s2 + $0x50] ss:$12 sps:$4 sm:$0xff]  }
  0x14   : > { %1486 = vmatprep.subr.bf16.mxu1 %v1662_v19  ;;  %v1618_v41 = vld [vmem:[%s2011_s2 + $0x38] ss:$12 sps:$4 sm:$0xff]   ;;  %v1619_v42 = vld [vmem:[%s2011_s2 + $0x20] ss:$12 sps:$4 sm:$0xff]   ;;  %v1620_v43 = vld [vmem:[%s2011_s2 + $0x8] ss:$12 sps:$4 sm:$0xff]  }
  0x15   : > { %653 = vmatpush1.bf16.msra.mxu0 %v1597_v6  ;;  %v512_v25 = vrot.slane %v1827_v24, %v511_v22  ;;  %v508_v27 = vrot.slane %v1827_v24, %v507_v23  ;;  %v1414_v48 = vld [vmem:[%s468_s24] ss:$0 sm:$0xff]  ;;  %vm785_vm2 = vcmask 64512   ;;  %v515_v1 = vsub.s32 2, %v1820_v21 }
  0x16   : > { %654 = vmatprep.subr.bf16.mxu0 %v1598_v7  ;;  %vm801_vm3 = vcmask 1043456   ;;  %vm989_vm4 = vcmask 261120  }
  0x17   : > { %1487 = vmatpush3.bf16.msra.mxu1 %v1614_v37  ;;  %v516_v3 = vrot.slane %v1827_v24, %v515_v1 }
  0x18   : > { %1488 = vmatprep.subr.bf16.mxu1 %v1662_v19 }
  0x19   : > { %655 = vmatpush1.bf16.msra.mxu0 %v1600_v8 }
  0x1a   : > { %656 = vmatprep.subr.bf16.mxu0 %v1601_v9 }
  0x1b   : > { %1489 = vmatpush3.bf16.msra.mxu1 %v1615_v38 }
  0x1c   : > { %1490 = vmatprep.subr.bf16.mxu1 %v1662_v19 }
  0x1d   : > { %657 = vmatpush1.bf16.msra.mxu0 %v1603_v10 }
  0x1e   : > { %658 = vmatprep.subr.bf16.mxu0 %v1604_v11 }
  0x1f   : > { %1491 = vmatpush3.bf16.msra.mxu1 %v1616_v39 }
  0x20   : > { %1492 = vmatprep.subr.bf16.mxu1 %v1662_v19 }
  0x21   : > { %659 = vmatpush1.bf16.msra.mxu0 %v1606_v12 }
  0x22   : > { %660 = vmatprep.subr.bf16.mxu0 %v1607_v13 }
  0x23   : > { %1493 = vmatpush3.bf16.msra.mxu1 %v1617_v40 }
  0x24   : > { %1494 = vmatprep.subr.bf16.mxu1 %v1662_v19 }
  0x25   : > { %661 = vmatpush1.bf16.msra.mxu0 %v1609_v14 }
  0x26   : > { %662 = vmatprep.subr.bf16.mxu0 %v1610_v15 }
  0x27   : > { %1495 = vmatpush3.bf16.msra.mxu1 %v1618_v41 }
  0x28   : > { %1496 = vmatprep.subr.bf16.mxu1 %v1662_v19 }
  0x29   : > { %663 = vmatpush1.bf16.msra.mxu0 %v1612_v16 }
  0x2a   : > { %1504 = vmatprep.subr.bf16.mxu0 %v1662_v19 }
  0x2b   : > { %1497 = vmatpush3.bf16.msra.mxu1 %v1619_v42 }
  0x2c   : > { %681 = vmatmul.mubr.bf16.vlgmr.msra.gmra.mxu0 %v470_v18  ;;  %1498 = vmatprep.subr.bf16.mxu1 %v1662_v19 }
  0x2d   : > { %1506 = vmatprep.mubr.msk.bf16.mxu0 %vm1663_vm0, %v1662_v19 }
  0x2f   : > { %1499 = vmatpush3.bf16.msra.mxu1 %v1620_v43  ;;  %v1418_v43 = vld [vmem:[%s2014_s5] ss:$0 sm:$0xff] }
  0x30   : > { %1510 = vmatprep.subr.bf16.mxu1 %v1662_v19 }
  0x32   : > { %1501 = vmatmul.mubr.bf16.vlgmr.msra.gmra.mxu1 %v470_v18 }
  0x33   : > { %1512 = vmatprep.mubr.msk.bf16.mxu1 %vm1663_vm0, %v1662_v19 }
  0xec   : > { %v682_v26 = vpop.f32.mrf.mxu0 }
  0xed   : > { %v683_v31 = vadd.f32 %v682_v26, %v508_v27 }
  0xee   : > { %v684_v28 = vpop.f32.mrf.mxu0 }
  0xef   : > { %v685_v29 = vadd.f32 %v684_v28, %v512_v25  ;;  %v729_v35 = vpack.c.bf16 %v683_v31, %v683_v31 }
  0xf0   : > { %v686_v30 = vpop.f32.mrf.mxu0 }
  0xf1   : > { %v730_v32 = vpack.c.bf16 %v685_v29, %v685_v29  ;;  %v1621_v30 = vld [vmem:[%s2013_s4 + $0x8] sm:$0xff]  }
  0xf2   : > { %v687_v33 = vpop.f32.mrf.mxu0  ;;  %v723_v2 = vpop.f32.mrf.mxu1 }
  0xf3   : > { %v737_v34 = vsel %vm732_vm1, %v730_v32, 0  ;;  %849 = vrot.lane.b32.xlu0 %v730_v32, %s1664_s15  ;;  %v724_v5 = vadd.f32 %v723_v2, %v516_v3  ;;  %v1422_v2 = vld [vmem:[%s2015_s6] ss:$0 sm:$0xff] }
  0xf4   : > { %1505 = vmatpush3.bf16.xpose.msra.mxu0 %v737_v34  ;;  %v1502_v4 = vpop.f32.mrf.mxu1 }
  0xf5   : > { %1516 = vmatprep.subr.bf16.mxu0 %v1662_v19  ;;  %v731_v7 = vpack.c.bf16 %v724_v5, %v724_v5  ;;  %v1423_v4 = vld [vmem:[%s2016_s7] ss:$0 sm:$0xff] }
  0xf6   : > { %v726_v6 = vpop.f32.mrf.mxu1 }
  0xf7   : > { %846 = vrot.lane.b32.xlu0 %v729_v35, %s1664_s15  ;;  %v803_v9 = vsel %vm801_vm3, %v731_v7, 0 }
  0xf8   : > { %v1503_v8 = vpop.f32.mrf.mxu1  ;;  %1511 = vmatpush3.bf16.msra.mxu1 %v803_v9  ;;  %v1632_v9 = vld [vmem:[%s2019_s10 + $0x30] sm:$0xff]  }
  0xf9   : > { %1522 = vmatprep.subr.bf16.mxu1 %v1662_v19  ;;  %v1631_v8 = vld [vmem:[%s2019_s10 + $0x38] sm:$0xff]  }
  0xfb   : > { %1507 = vmatmul.mubr.msk.bf16.vlgmr.msra.gmra.mxu0 %vm732_vm1, %v729_v35  ;;  %v1622_v35 = vld [vmem:[%s2013_s4] sm:$0xff]  }
  0xfc   : > { %1518 = vmatprep.mubr.msk.bf16.mxu0 %vm1663_vm0, %v1662_v19 }
 0x165   : > { %v850_v44 = vpop.permute.xlu0 %849 }
 0x166   : > { %v855_v45 = vsel %vm732_vm1, %v850_v44, 0 }
 0x167   : > { %1517 = vmatpush3.bf16.xpose.msra.mxu0 %v855_v45 }
 0x168   : > { %1528 = vmatprep.subr.bf16.mxu0 %v1662_v19 }
 0x169   : > { %v847_v46 = vpop.permute.xlu0 %846 }
 0x16e   : > { %1519 = vmatmul.mubr.msk.bf16.vlgmr.msra.gmra.mxu0 %vm732_vm1, %v847_v46 }
 0x16f   : > { %1532 = vmatprep.mubr.msk.bf16.mxu0 %vm1663_vm0, %v1662_v19  ;;  %1529 = vmatpush3.bf16.msra.mxu0 %v1621_v30 }
 0x170   : > { %1530 = vmatprep.subr.bf16.mxu0 %v1662_v19 }
 0x173   : > { %1531 = vmatpush3.bf16.msra.mxu0 %v1622_v35 }
 0x174   : > { %1556 = vmatprep.subr.bf16.mxu0 %v1662_v19 }
 0x1bb   : > { %v773_v47 = vpop.f32.mrf.mxu0 }
 0x1bc   : > { %v779_v49 = vmul.f32 0.25, %v773_v47 }
 0x1bd   : > { %v1508_v50 = vpop.f32.mrf.mxu0 }
 0x1be   : > { %v784_v51 = vadd.f32 %v1414_v48, %v779_v49  ;;  %v1623_v50 = vld [vmem:[%s2017_s8 + $0x38] sm:$0xff]  }
 0x1bf   : > { %v776_v52 = vpop.f32.mrf.mxu0 }
 0x1c0   : > { %v786_v53 = vsel %vm785_vm2, %v784_v51, -inf  ;;  %v1922_v52 = vand.u32 127, %v465_v20  ;;  %v1626_v20 = vld [vmem:[%s2017_s8 + $0x20] sm:$0xff]  }
 0x1c1   : > { %787 = vmax.xlane.f32.xlu1 %v786_v53  ;;  %v1509_v54 = vpop.f32.mrf.mxu0 }
 0x1c2   : > { %vm467_vm5 = vcmp.lt.s32.totalorder %v1922_v52, 32 }
 0x22e   : > { %v891_v55 = vpop.f32.mrf.mxu0 }
 0x22f   : > { %v897_v56 = vmul.f32 0.25, %v891_v55 }
 0x230   : > { %v1520_v57 = vpop.f32.mrf.mxu0 }
 0x231   : > { %v898_v58 = vadd.f32 %v1414_v48, %v897_v56  ;;  %v1625_v57 = vld [vmem:[%s2017_s8 + $0x28] sm:$0xff]  }
 0x232   : > { %v894_v59 = vpop.f32.mrf.mxu0 }
 0x233   : > { %v899_v60 = vsel %vm785_vm2, %v898_v58, -inf  ;;  %v1628_v59 = vld [vmem:[%s2017_s8 + $0x10] sm:$0xff]  }
 0x234   : > { %900 = vmax.xlane.f32.xlu1 %v899_v60  ;;  %v1521_v61 = vpop.f32.mrf.mxu0  ;;  %v1629_v60 = vld [vmem:[%s2017_s8 + $0x8] sm:$0xff]  }
 0x235   : > { %v1630_v61 = vld [vmem:[%s2017_s8] sm:$0xff]  }
 0x24a   : > { %v788_v62 = vpop.xlane.xlu1 %787 }
 0x24b   : > { %v789_v63 = vsub.f32 %v784_v51, %v788_v62  ;;  %v1624_v51 = vld [vmem:[%s2017_s8 + $0x30] sm:$0xff]  }
 0x24d   : > { %v790_v0 = vmul.f32 1.442695, %v789_v63 }
 0x24f   : > { %1639 = vpow2.f32 %v790_v0 }
 0x25c   : > { %v1640_v10 = vpop.eup %1639 }
 0x25d   : > { %v792_v11 = vsel %vm785_vm2, %v1640_v10, 0.0 }
 0x25e   : > { %793 = vadd.xlane.f32.xlu0 %v792_v11  ;;  %v1634_v11 = vld [vmem:[%s2019_s10 + $0x20] sm:$0xff]  }
 0x2bd   : > { %v901_v12 = vpop.xlane.xlu1 %900 }
 0x2be   : > { %v902_v13 = vsub.f32 %v898_v58, %v901_v12  ;;  %v1627_v58 = vld [vmem:[%s2017_s8 + $0x18] sm:$0xff]  }
 0x2bf   : > { %v1635_v12 = vld [vmem:[%s2019_s10 + $0x18] sm:$0xff]  }
 0x2c0   : > { %v903_v14 = vmul.f32 1.442695, %v902_v13  ;;  %v1636_v13 = vld [vmem:[%s2019_s10 + $0x10] sm:$0xff]  }
 0x2c2   : > { %1641 = vpow2.f32 %v903_v14  ;;  %v1637_v14 = vld [vmem:[%s2019_s10 + $0x8] sm:$0xff]  }
 0x2cf   : > { %v1642_v15 = vpop.eup %1641 }
 0x2d0   : > { %v905_v16 = vsel %vm785_vm2, %v1642_v15, 0.0 }
 0x2d1   : > { %906 = vadd.xlane.f32.xlu1 %v905_v16  ;;  %v1424_v16 = vld [vmem:[%s2018_s9] ss:$0 sm:$0xff] }
 0x2e2   : > { %912 = vrot.lane.b32.xlu1 %v731_v7, %s1664_s15  ;;  %s462_s15 = scalar_lea.vmem %s2023_s14, %s1387_s18 }
 0x2e7   : > { %v794_v18 = vpop.xlane.xlu0 %793 }
 0x2e8   : > { %1643 = vrcp.f32 %v794_v18 }
 0x2f5   : > { %v1644_v21 = vpop.eup %1643 }
 0x2f6   : > { %v796_v22 = vmul.f32 %v1644_v21, %v1640_v10  ;;  %v1633_v10 = vld [vmem:[%s2019_s10 + $0x28] sm:$0xff]  }
 0x2f8   : > { %v797_v23 = vpack.c.bf16 %v796_v22, %v796_v22 }
 0x2fa   : > { %1513 = vmatmul.mubr.msk.bf16.vlgmr.msra.gmra.mxu1 %vm785_vm2, %v797_v23 }
 0x2fb   : > { %1524 = vmatprep.mubr.msk.bf16.mxu1 %vm1663_vm0, %v1662_v19 }
 0x35a   : > { %v907_v24 = vpop.xlane.xlu1 %906 }
 0x35b   : > { %1645 = vrcp.f32 %v907_v24 }
 0x35e   : > { %v913_v25 = vpop.permute.xlu1 %912 }
 0x35f   : > { %v918_v26 = vsel %vm801_vm3, %v913_v25, 0 }
 0x360   : > { %1523 = vmatpush3.bf16.msra.mxu1 %v918_v26 }
 0x361   : > { %1536 = vmatprep.subr.bf16.mxu1 %v1662_v19 }
 0x368   : > { %v1646_v27 = vpop.eup %1645 }
 0x369   : > { %v909_v28 = vmul.f32 %v1646_v27, %v1642_v15  ;;  %v1638_v15 = vld [vmem:[%s2019_s10] sm:$0xff]  }
 0x36b   : > { %v910_v29 = vpack.c.bf16 %v909_v28, %v909_v28 }
 0x36d   : > { %1525 = vmatmul.mubr.msk.bf16.vlgmr.msra.gmra.mxu1 %vm785_vm2, %v910_v29 }
 0x36e   : > { %1552 = vmatprep.mubr.msk.bf16.mxu1 %vm1663_vm0, %v1662_v19  ;;  %1537 = vmatpush3.bf16.msra.mxu1 %v1623_v50  ;;  %v1442_v50 = vld [vmem:[%s2021_s12] ss:$0 sm:$0xff] }
 0x36f   : > { %1538 = vmatprep.subr.bf16.mxu1 %v1662_v19 }
 0x372   : > { %1539 = vmatpush3.bf16.msra.mxu1 %v1624_v51 }
 0x373   : > { %1540 = vmatprep.subr.bf16.mxu1 %v1662_v19 }
 0x376   : > { %1541 = vmatpush3.bf16.msra.mxu1 %v1625_v57 }
 0x377   : > { %1542 = vmatprep.subr.bf16.mxu1 %v1662_v19 }
 0x37a   : > { %1543 = vmatpush3.bf16.msra.mxu1 %v1626_v20 }
 0x37b   : > { %1544 = vmatprep.subr.bf16.mxu1 %v1662_v19 }
 0x37e   : > { %1545 = vmatpush3.bf16.msra.mxu1 %v1627_v58 }
 0x37f   : > { %1546 = vmatprep.subr.bf16.mxu1 %v1662_v19 }
 0x382   : > { %1547 = vmatpush3.bf16.msra.mxu1 %v1628_v59 }
 0x383   : > { %1548 = vmatprep.subr.bf16.mxu1 %v1662_v19 }
 0x386   : > { %1549 = vmatpush3.bf16.msra.mxu1 %v1629_v60 }
 0x387   : > { %1550 = vmatprep.subr.bf16.mxu1 %v1662_v19 }
 0x38a   : > { %1551 = vmatpush3.bf16.msra.mxu1 %v1630_v61 }
 0x3ba   : > { %v839_v31 = vpop.f32.mrf.mxu1 }
 0x3bc   : > { %v1514_v32 = vpop.f32.mrf.mxu1 }
 0x3be   : > { %v842_v33 = vpop.f32.mrf.mxu1 }
 0x3c0   : > { %v1515_v34 = vpop.f32.mrf.mxu1 }
 0x3c1   : > { %v1433_v34 = vld [vmem:[%s2020_s11] ss:$0 sm:$0xff] }
 0x42d   : > { %v954_v36 = vpop.f32.mrf.mxu1 }
 0x42e   : > { %961 = vrot.lane.b32.xlu1 %v954_v36, %s1665_s28 }
 0x42f   : > { %v1526_v37 = vpop.f32.mrf.mxu1 }
 0x431   : > { %v957_v38 = vpop.f32.mrf.mxu1 }
 0x433   : > { %v1527_v39 = vpop.f32.mrf.mxu1 }
 0x4a0   : > { %v962_v40 = vpop.permute.xlu1 %961 }
 0x4a1   : > { %v964_v41 = vsel %vm732_vm1, %v839_v31, %v962_v40 }
 0x4a2   : > { %v965_v42 = vpack.c.bf16 %v964_v41, %v964_v41 }
 0x4a4   : > { %1533 = vmatmul.mubr.msk.bf16.vlgmr.msra.gmra.mxu0 %vm989_vm4, %v965_v42 }
 0x4a5   : > { %1572 = vmatprep.mubr.msk.bf16.mxu0 %vm1663_vm0, %v1662_v19  ;;  %1557 = vmatpush3.bf16.msra.mxu0 %v1631_v8 }
 0x4a6   : > { %1558 = vmatprep.subr.bf16.mxu0 %v1662_v19 }
 0x4a9   : > { %1559 = vmatpush3.bf16.msra.mxu0 %v1632_v9 }
 0x4aa   : > { %1560 = vmatprep.subr.bf16.mxu0 %v1662_v19 }
 0x4ad   : > { %1561 = vmatpush3.bf16.msra.mxu0 %v1633_v10 }
 0x4ae   : > { %1562 = vmatprep.subr.bf16.mxu0 %v1662_v19 }
 0x4b1   : > { %1563 = vmatpush3.bf16.msra.mxu0 %v1634_v11 }
 0x4b2   : > { %1564 = vmatprep.subr.bf16.mxu0 %v1662_v19 }
 0x4b5   : > { %1565 = vmatpush3.bf16.msra.mxu0 %v1635_v12 }
 0x4b6   : > { %1566 = vmatprep.subr.bf16.mxu0 %v1662_v19 }
 0x4b9   : > { %1567 = vmatpush3.bf16.msra.mxu0 %v1636_v13 }
 0x4ba   : > { %1568 = vmatprep.subr.bf16.mxu0 %v1662_v19 }
 0x4bd   : > { %1569 = vmatpush3.bf16.msra.mxu0 %v1637_v14 }
 0x4be   : > { %1570 = vmatprep.subr.bf16.mxu0 %v1662_v19 }
 0x4c1   : > { %1571 = vmatpush3.bf16.msra.mxu0 %v1638_v15 }
 0x564   : > { %v1027_v44 = vpop.f32.mrf.mxu0 }
 0x565   : > { %v1028_v45 = vadd.f32 %v1418_v43, %v1027_v44 }
 0x566   : > { %v1534_v46 = vpop.f32.mrf.mxu0 }
 0x567   : > { %v1033_v47 = vadd.f32 %v1028_v45, %v1809_v17 }
 0x568   : > { %v1030_v48 = vpop.f32.mrf.mxu0 }
 0x569   : > { %1036 = vadd.xlane.f32.xlu1 %v1033_v47 }
 0x56a   : > { %v1535_v49 = vpop.f32.mrf.mxu0 }
 0x5f2   : > { %v1037_v17 = vpop.xlane.xlu1 %1036 }
 0x5f3   : > { %v1039_v53 = vmul.f32 0.03125, %v1037_v17  ;;  %v1443_v17 = vld [vmem:[%s2022_s13] ss:$0 sm:$0xff] }
 0x5f5   : > { %v1040_v54 = vsub.f32 %v1033_v47, %v1039_v53 }
 0x5f7   : > { %v1043_v55 = vsel %vm467_vm5, %v1040_v54, 0.0 }
 0x5f8   : > { %v1044_v56 = vmul.f32 %v1043_v55, %v1043_v55 }
 0x5fa   : > { %1045 = vadd.xlane.f32.xlu0 %v1044_v56 }
 0x683   : > { %v1046_v62 = vpop.xlane.xlu0 %1045 }
 0x684   : > { %v1047_v63 = vmul.f32 0.03125, %v1046_v62 }
 0x686   : > { %v1048_v0 = vadd.f32 1e-12, %v1047_v63 }
 0x688   : > { %1647 = vrsqrt.f32 %v1048_v0 }
 0x695   : > { %v1648_v1 = vpop.eup %1647 }
 0x696   : > { %v1050_v3 = vmul.f32 %v1648_v1, %v1043_v55 }
 0x698   : > { %v1057_v5 = vmul.f32 %v1422_v2, %v1050_v3 }
 0x69a   : > { %v1064_v6 = vadd.f32 %v1423_v4, %v1057_v5 }
 0x69c   : > { %v1065_v7 = vpack.c.bf16 %v1064_v6, %v1064_v6 }
 0x69e   : > { %1553 = vmatmul.mubr.bf16.vlgmr.msra.gmra.mxu1 %v1065_v7 }
 0x75e   : > { %v1171_v18 = vpop.f32.mrf.mxu1 }
 0x75f   : > { %v1172_v21 = vadd.f32 %v1424_v16, %v1171_v18 }
 0x760   : > { %v1554_v22 = vpop.f32.mrf.mxu1 }
 0x761   : > { %v1178_v23 = vmul.f32 0.044715, %v1172_v21  ;;  %v1177_v31 = vmul.f32 0.5, %v1172_v21 }
 0x762   : > { %v1174_v24 = vpop.f32.mrf.mxu1 }
 0x763   : > { %v1179_v25 = vmul.f32 %v1178_v23, %v1172_v21 }
 0x764   : > { %v1555_v26 = vpop.f32.mrf.mxu1 }
 0x765   : > { %v1180_v27 = vmul.f32 %v1179_v25, %v1172_v21 }
 0x767   : > { %v1181_v28 = vadd.f32 %v1180_v27, %v1172_v21 }
 0x769   : > { %v1182_v29 = vmul.f32 0.7978846, %v1181_v28 }
 0x76b   : > { %1649 = vtanh.f32 %v1182_v29 }
 0x778   : > { %v1650_v30 = vpop.eup %1649 }
 0x779   : > { %v1184_v32 = vadd.f32 1.0, %v1650_v30 }
 0x77b   : > { %v1185_v19 = vmul.f32 %v1184_v32, %v1177_v31 }
 0x77d   : > { %v1186_v33 = vpack.c.bf16 %v1185_v19, %v1185_v19 }
 0x77f   : > { %1573 = vmatmul.mubr.bf16.vlgmr.msra.gmra.mxu0 %v1186_v33 }
 0x83f   : > { %v1292_v35 = vpop.f32.mrf.mxu0 }
 0x840   : > { %v1293_v36 = vadd.f32 %v1433_v34, %v1292_v35 }
 0x841   : > { %v1574_v37 = vpop.f32.mrf.mxu0 }
 0x842   : > { %v1298_v38 = vadd.f32 %v1293_v36, %v1064_v6 }
 0x843   : > { %v1295_v39 = vpop.f32.mrf.mxu0 }
 0x844   : > { %1301 = vadd.xlane.f32.xlu0 %v1298_v38 }
 0x845   : > { %v1575_v40 = vpop.f32.mrf.mxu0 }
 0x8cd   : > { %v1302_v41 = vpop.xlane.xlu0 %1301 }
 0x8ce   : > { %v1303_v42 = vmul.f32 0.03125, %v1302_v41 }
 0x8d0   : > { %v1304_v43 = vsub.f32 %v1298_v38, %v1303_v42 }
 0x8d2   : > { %v1305_v44 = vsel %vm467_vm5, %v1304_v43, 0.0 }
 0x8d3   : > { %v1306_v45 = vmul.f32 %v1305_v44, %v1305_v44 }
 0x8d5   : > { %1307 = vadd.xlane.f32.xlu0 %v1306_v45 }
 0x95e   : > { %v1308_v46 = vpop.xlane.xlu0 %1307 }
 0x95f   : > { %v1309_v47 = vmul.f32 0.03125, %v1308_v46 }
 0x961   : > { %v1310_v48 = vadd.f32 1e-12, %v1309_v47 }
 0x963   : > { %1651 = vrsqrt.f32 %v1310_v48 }
 0x970   : > { %v1652_v49 = vpop.eup %1651 }
 0x971   : > { %v1312_v51 = vmul.f32 %v1652_v49, %v1305_v44 }
 0x973   : > { %v1319_v53 = vmul.f32 %v1442_v50, %v1312_v51 }
 0x975   : > { %v1326_v52 = vadd.f32 %v1443_v17, %v1319_v53 }
 0x977   : > { %1327 = vst [vmem:[%s462_s15] sm:$0xff] %v1326_v52 }
 0x978 PF: > { %s24_s29 = sadd.s32 1, %s1659_s29  }
 0x979   : > { %p21_p4 = scmp.ge.s32.totalorder %s24_s29, 4  }
 0x97b   :  { %23 = sbr.rel (!%p21_p4) target bundleno = 1 (0x1), region = 107 }

// kernel: bert_nli_forward.3
= control target key start
LH: loop header
LB: loop body
LE: loop exit
PB: predicated region body
PF: predicated region fallthrough
CT: control target
= control target key end

     0   :  { %s1837_s21 = smov 0   ;;  %s2103_s0 = inlined_call_operand.vmem [shape: f32[16,128], index: 0, kind: input, shape index: {}, may-alias: {0,16}]   ;;  %s2104_s1 = inlined_call_operand.vmem [shape: f32[2,8], index: 1, kind: input, shape index: {}]   ;;  %s2105_s2 = inlined_call_operand.vmem [shape: f32[1,128], index: 2, kind: input, shape index: {}]   ;;  %s2106_s3 = inlined_call_operand.vmem [shape: f32[1,128], index: 3, kind: input, shape index: {}]   ;;  %s2107_s4 = inlined_call_operand.vmem [shape: bf16[128,384], index: 4, kind: input, shape index: {}]   ;;  %s2108_s5 = inlined_call_operand.vmem [shape: f32[1,384], index: 5, kind: input, shape index: {}]   ;;  %s2109_s6 = inlined_call_operand.vmem [shape: bf16[32,128], index: 6, kind: input, shape index: {}]   ;;  %s2110_s7 = inlined_call_operand.vmem [shape: f32[1,128], index: 7, kind: input, shape index: {}]   ;;  %s2111_s8 = inlined_call_operand.vmem [shape: f32[1,128], index: 8, kind: input, shape index: {}]   ;;  %s2112_s9 = inlined_call_operand.vmem [shape: f32[1,128], index: 9, kind: input, shape index: {}]   ;;  %s2113_s10 = inlined_call_operand.vmem [shape: bf16[128,128], index: 10, kind: input, shape index: {}]   ;;  %s2114_s11 = inlined_call_operand.vmem [shape: f32[1,128], index: 11, kind: input, shape index: {}]   ;;  %s2115_s12 = inlined_call_operand.vmem [shape: bf16[128,128], index: 12, kind: input, shape index: {}]   ;;  %s2116_s13 = inlined_call_operand.vmem [shape: f32[1,128], index: 13, kind: input, shape index: {}]   ;;  %s2117_s14 = inlined_call_operand.vmem [shape: f32[1,128], index: 14, kind: input, shape index: {}]   ;;  %s2118_s15 = inlined_call_operand.vmem [shape: f32[1,128], index: 15, kind: input, shape index: {}]   ;;  %s2119_s16 = inlined_call_operand.vmem [shape: f32[16,128], index: 16, kind: output, shape index: {}, may-alias: {0,16}]  }
   0x1   :  { %2120 = sst [smem:[#allocation2_spill]] %s2103_s0 }
   0x2 LB: > { %s1843_s22 = sadd.s32 4294967295, %s1745_s21   ;;  %p1468_p0 = scmp.ge.s32.totalorder %s1745_s21, 1  ;;  %s1745_s21 = sphi %s1837_s21, %s26_s21  }
   0x3   : > { %p461_p1 = scmp.lt.s32.totalorder %s1745_s21, 3 }
   0x5   : > { %p462_p2 = pnand %p1468_p0, %p461_p1 }
   0x6   : > { %p509_p3 = scmp.lt.s32.totalorder (!%p462_p2), %s1843_s22, 1  ;;  %s2121_s27 = sld [smem:[#allocation2_spill]] (!%p462_p2) }
   0x7   : > { %465 = sbr.rel (%p462_p2) target bundleno = 2706 (0xa92), region = 84  ;;  %s553_s0 = scalar_lea.vmem (!%p462_p2), %s2104_s1, %s1843_s22 }
   0x8   : > { %s1751_s20 = smov (!%p462_p2), 16  }
   0xc   : > { %s1849_s23 = scalar_select %p509_p3, %s1843_s22, 1  ;;  %v1673_v1 = vld [vmem:[%s2107_s4 + $0xac] ss:$12 sps:$4 sm:$0xff]   ;;  %v1675_v2 = vld [vmem:[%s2107_s4 + $0xa8] ss:$12 sps:$4 sm:$0xff]   ;;  %v1747_v3 = vmov 0.0   ;;  %v519_v8 = vlaneseq }
   0xd   : > { %1568 = vmatprep.subr.bf16.mxu1 %v1747_v3  ;;  %v1676_v4 = vld [vmem:[%s2107_s4 + $0xb0] ss:$12 sps:$4 sm:$0xff]   ;;  %v1677_v5 = vld [vmem:[%s2107_s4 + $0x94] ss:$12 sps:$4 sm:$0xff]   ;;  %733 = vmatprep.subr.bf16.mxu0 %v1673_v1  ;;  %v1680_v7 = vld [vmem:[%s2107_s4 + $0x98] ss:$12 sps:$4 sm:$0xff]  }
   0xe   : > { %s1469_s24 = sshll.u32 %s1849_s23, 3  ;;  %734 = vmatpush1.bf16.msra.mxu0 %v1675_v2  ;;  %1569 = vmatpush3.bf16.msra.mxu1 %v1676_v4  ;;  %v1679_v6 = vld [vmem:[%s2107_s4 + $0x90] ss:$12 sps:$4 sm:$0xff]   ;;  %v1879_v9 = vand.u32 127, %v519_v8  ;;  %v1683_v16 = vld [vmem:[%s2107_s4 + $0x78] ss:$12 sps:$4 sm:$0xff]  }
   0xf   : > { %s512_s28 = scalar_lea.vmem %s2121_s27, %s1469_s24  ;;  %735 = vmatprep.subr.bf16.mxu0 %v1677_v5  ;;  %1570 = vmatprep.subr.bf16.mxu1 %v1747_v3  ;;  %v1681_v15 = vld [vmem:[%s2107_s4 + $0x7c] ss:$12 sps:$4 sm:$0xff]   ;;  %v1684_v17 = vld [vmem:[%s2107_s4 + $0x80] ss:$12 sps:$4 sm:$0xff]   ;;  %v1685_v18 = vld [vmem:[%s2107_s4 + $0x64] ss:$12 sps:$4 sm:$0xff]   ;;  %s516_s25 = scalar_lea.vmem %s2119_s16, %s1469_s24 }
  0x10   : > { %v518_v0 = vld [vmem:[%s512_s28] sm:$0xff]  ;;  %vm521_vm0 = vcmp.lt.s32.totalorder %v1879_v9, 32  ;;  %v1688_v20 = vld [vmem:[%s2107_s4 + $0x68] ss:$12 sps:$4 sm:$0xff]   ;;  %v1689_v21 = vld [vmem:[%s2107_s4 + $0x4c] ss:$12 sps:$4 sm:$0xff]  }
  0x11   : > { %524 = vadd.xlane.f32.xlu0 %v518_v0  ;;  %v1687_v19 = vld [vmem:[%s2107_s4 + $0x60] ss:$12 sps:$4 sm:$0xff]   ;;  %v1691_v22 = vld [vmem:[%s2107_s4 + $0x48] ss:$12 sps:$4 sm:$0xff]   ;;  %v1692_v23 = vld [vmem:[%s2107_s4 + $0x50] ss:$12 sps:$4 sm:$0xff]  }
  0x12   : > { %736 = vmatpush1.bf16.msra.mxu0 %v1679_v6  ;;  %1571 = vmatpush3.bf16.msra.mxu1 %v1680_v7  ;;  %v1693_v24 = vld [vmem:[%s2107_s4 + $0x34] ss:$12 sps:$4 sm:$0xff]   ;;  %v1748_v25 = vmov 0   ;;  %vm1749_vm1 = vmmov 0   ;;  %v1695_v26 = vld [vmem:[%s2107_s4 + $0x30] ss:$12 sps:$4 sm:$0xff]  }
  0x13   : > { %1572 = vmatprep.subr.bf16.mxu1 %v1747_v3  ;;  %737 = vmatprep.subr.bf16.mxu0 %v1681_v15  ;;  %v1696_v27 = vld [vmem:[%s2107_s4 + $0x38] ss:$12 sps:$4 sm:$0xff]   ;;  %v1697_v28 = vld [vmem:[%s2107_s4 + $0x1c] ss:$12 sps:$4 sm:$0xff]   ;;  %v1700_v30 = vld [vmem:[%s2107_s4 + $0x20] ss:$12 sps:$4 sm:$0xff]  }
  0x14   : > { %765 = vmatprep.mubr.bf16.mxu0 %v1748_v25  ;;  %1584 = vmatprep.mubr.msk.bf16.mxu1 %vm1749_vm1, %v1747_v3  ;;  %v1699_v29 = vld [vmem:[%s2107_s4 + $0x18] ss:$12 sps:$4 sm:$0xff]   ;;  %v1703_v32 = vld [vmem:[%s2107_s4] ss:$12 sps:$4 sm:$0xff]   ;;  %v1704_v33 = vld [vmem:[%s2107_s4 + $0x8] ss:$12 sps:$4 sm:$0xff]  }
  0x15   : > { %v1701_v31 = vld [vmem:[%s2107_s4 + $0x4] ss:$12 sps:$4 sm:$0xff]   ;;  %v1471_v38 = vld [vmem:[%s2105_s2] ss:$0 sm:$0xff]  ;;  %v591_v44 = vshrl.u32 %v519_v8, 7  ;;  %vm886_vm2 = vcmask 1043456  }
  0x16   : > { %738 = vmatpush1.bf16.msra.mxu0 %v1683_v16  ;;  %1573 = vmatpush3.bf16.msra.mxu1 %v1684_v17  ;;  %v1472_v40 = vld [vmem:[%s2106_s3] ss:$0 sm:$0xff]  ;;  %vm817_vm3 = vcmask 130048   ;;  %s1750_s28 = smov 112   ;;  %vm870_vm4 = vcmask 64512   ;;  %vm1074_vm5 = vcmask 261120  }
  0x17   : > { %1574 = vmatprep.subr.bf16.mxu1 %v1747_v3  ;;  %739 = vmatprep.subr.bf16.mxu0 %v1685_v18  ;;  %v600_v45 = vsub.s32 2, %v591_v44  ;;  %v588_v46 = vld [vmem:[%s2108_s5] sm:$0x7]  ;;  %v596_v47 = vsub.s32 1, %v591_v44  ;;  %v592_v48 = vsub.s32 0, %v591_v44 }
  0x19   : > { %v601_v49 = vrot.slane %v588_v46, %v600_v45  ;;  %v597_v50 = vrot.slane %v588_v46, %v596_v47  ;;  %v593_v53 = vrot.slane %v588_v46, %v592_v48  ;;  %v1705_v45 = vld [vmem:[%s2109_s6 + $0x8] sm:$0xff]  }
  0x1a   : > { %740 = vmatpush1.bf16.msra.mxu0 %v1687_v19  ;;  %1575 = vmatpush3.bf16.msra.mxu1 %v1688_v20 }
  0x1b   : > { %741 = vmatprep.subr.bf16.mxu0 %v1689_v21  ;;  %1576 = vmatprep.subr.bf16.mxu1 %v1747_v3 }
  0x1e   : > { %742 = vmatpush1.bf16.msra.mxu0 %v1691_v22  ;;  %1577 = vmatpush3.bf16.msra.mxu1 %v1692_v23 }
  0x1f   : > { %743 = vmatprep.subr.bf16.mxu0 %v1693_v24  ;;  %1578 = vmatprep.subr.bf16.mxu1 %v1747_v3 }
  0x22   : > { %744 = vmatpush1.bf16.msra.mxu0 %v1695_v26  ;;  %1579 = vmatpush3.bf16.msra.mxu1 %v1696_v27 }
  0x23   : > { %745 = vmatprep.subr.bf16.mxu0 %v1697_v28  ;;  %1580 = vmatprep.subr.bf16.mxu1 %v1747_v3 }
  0x26   : > { %746 = vmatpush1.bf16.msra.mxu0 %v1699_v29  ;;  %1581 = vmatpush3.bf16.msra.mxu1 %v1700_v30 }
  0x27   : > { %747 = vmatprep.subr.bf16.mxu0 %v1701_v31  ;;  %1582 = vmatprep.subr.bf16.mxu1 %v1747_v3 }
  0x2a   : > { %748 = vmatpush1.bf16.msra.mxu0 %v1703_v32  ;;  %1583 = vmatpush3.bf16.msra.mxu1 %v1704_v33 }
  0x2b   : > { %1594 = vmatprep.subr.bf16.mxu1 %v1747_v3  ;;  %1588 = vmatprep.subr.bf16.mxu0 %v1747_v3 }
  0x9a   : > { %v525_v10 = vpop.xlane.xlu0 %524 }
  0x9b   : > { %v527_v11 = vmul.f32 0.03125, %v525_v10  ;;  %v1498_v10 = vld [vmem:[%s553_s0] ss:$0 sm:$0xff] }
  0x9d   : > { %v528_v12 = vsub.f32 %v518_v0, %v527_v11 }
  0x9f   : > { %v531_v13 = vsel %vm521_vm0, %v528_v12, 0.0 }
  0xa0   : > { %v532_v14 = vmul.f32 %v531_v13, %v531_v13 }
  0xa2   : > { %533 = vadd.xlane.f32.xlu0 %v532_v14 }
 0x12b   : > { %v534_v34 = vpop.xlane.xlu0 %533 }
 0x12c   : > { %v535_v35 = vmul.f32 0.03125, %v534_v34 }
 0x12e   : > { %v536_v36 = vadd.f32 1e-12, %v535_v35 }
 0x130   : > { %1723 = vrsqrt.f32 %v536_v36 }
 0x13d   : > { %v1724_v37 = vpop.eup %1723 }
 0x13e   : > { %v538_v39 = vmul.f32 %v1724_v37, %v531_v13 }
 0x140   : > { %v545_v41 = vmul.f32 %v1471_v38, %v538_v39 }
 0x142   : > { %v1953_v42 = vadd.f32 %v1472_v40, %v545_v41 }
 0x144   : > { %v555_v43 = vpack.c.bf16 %v1953_v42, %v1953_v42 }
 0x146   : > { %766 = vmatmul.mubr.bf16.vlgmr.msra.gmra.mxu0 %v555_v43  ;;  %1585 = vmatmul.mubr.bf16.vlgmr.msra.gmra.mxu1 %v555_v43 }
 0x147   : > { %1590 = vmatprep.mubr.msk.bf16.mxu0 %vm1749_vm1, %v1747_v3  ;;  %1596 = vmatprep.mubr.msk.bf16.mxu1 %vm1749_vm1, %v1747_v3 }
 0x206   : > { %v767_v51 = vpop.f32.mrf.mxu0  ;;  %v808_v52 = vpop.f32.mrf.mxu1 }
 0x207   : > { %v809_v54 = vadd.f32 %v808_v52, %v601_v49  ;;  %v768_v61 = vadd.f32 %v767_v51, %v593_v53 }
 0x208   : > { %v769_v55 = vpop.f32.mrf.mxu0  ;;  %v1586_v56 = vpop.f32.mrf.mxu1 }
 0x209   : > { %v816_v57 = vpack.c.bf16 %v809_v54, %v809_v54  ;;  %v770_v58 = vadd.f32 %v769_v55, %v597_v50  ;;  %v814_v4 = vpack.c.bf16 %v768_v61, %v768_v61  ;;  %v1706_v50 = vld [vmem:[%s2109_s6] sm:$0xff]  }
 0x20a   : > { %v771_v59 = vpop.f32.mrf.mxu0  ;;  %v811_v60 = vpop.f32.mrf.mxu1 }
 0x20b   : > { %v888_v62 = vsel %vm886_vm2, %v816_v57, 0  ;;  %v815_v63 = vpack.c.bf16 %v770_v58, %v770_v58  ;;  %v1502_v58 = vld [vmem:[%s2110_s7] ss:$0 sm:$0xff] }
 0x20c   : > { %v772_v0 = vpop.f32.mrf.mxu0  ;;  %v1587_v1 = vpop.f32.mrf.mxu1  ;;  %1595 = vmatpush3.bf16.msra.mxu1 %v888_v62 }
 0x20d   : > { %v822_v2 = vsel %vm817_vm3, %v815_v63, 0  ;;  %934 = vrot.lane.b32.xlu1 %v815_v63, %s1750_s28  ;;  %1606 = vmatprep.subr.bf16.mxu1 %v1747_v3  ;;  %v1707_v1 = vld [vmem:[%s2113_s10 + $0x38] sm:$0xff]  }
 0x20e   : > { %1589 = vmatpush3.bf16.xpose.msra.mxu0 %v822_v2  ;;  %v1708_v2 = vld [vmem:[%s2113_s10 + $0x30] sm:$0xff]  }
 0x20f   : > { %1600 = vmatprep.subr.bf16.mxu0 %v1747_v3 }
 0x211   : > { %931 = vrot.lane.b32.xlu1 %v814_v4, %s1750_s28 }
 0x215   : > { %1591 = vmatmul.mubr.msk.bf16.vlgmr.msra.gmra.mxu0 %vm817_vm3, %v814_v4 }
 0x216   : > { %1602 = vmatprep.mubr.msk.bf16.mxu0 %vm1749_vm1, %v1747_v3 }
 0x27f   : > { %v935_v5 = vpop.permute.xlu1 %934 }
 0x280   : > { %v940_v6 = vsel %vm817_vm3, %v935_v5, 0 }
 0x281   : > { %1601 = vmatpush3.bf16.xpose.msra.mxu0 %v940_v6 }
 0x282   : > { %1612 = vmatprep.subr.bf16.mxu0 %v1747_v3 }
 0x283   : > { %v932_v7 = vpop.permute.xlu1 %931 }
 0x288   : > { %1603 = vmatmul.mubr.msk.bf16.vlgmr.msra.gmra.mxu0 %vm817_vm3, %v932_v7 }
 0x289   : > { %1616 = vmatprep.mubr.msk.bf16.mxu0 %vm1749_vm1, %v1747_v3  ;;  %1613 = vmatpush3.bf16.msra.mxu0 %v1705_v45 }
 0x28a   : > { %1614 = vmatprep.subr.bf16.mxu0 %v1747_v3 }
 0x28d   : > { %1615 = vmatpush3.bf16.msra.mxu0 %v1706_v50 }
 0x28e   : > { %1640 = vmatprep.subr.bf16.mxu0 %v1747_v3 }
 0x2d5   : > { %v858_v8 = vpop.f32.mrf.mxu0 }
 0x2d6   : > { %v864_v11 = vmul.f32 0.25, %v858_v8  ;;  %v1709_v8 = vld [vmem:[%s2113_s10 + $0x28] sm:$0xff]  }
 0x2d7   : > { %v1592_v12 = vpop.f32.mrf.mxu0 }
 0x2d8   : > { %v869_v13 = vadd.f32 %v1498_v10, %v864_v11  ;;  %v1711_v11 = vld [vmem:[%s2113_s10 + $0x18] sm:$0xff]   ;;  %v1712_v12 = vld [vmem:[%s2113_s10 + $0x10] sm:$0xff]  }
 0x2d9   : > { %v861_v14 = vpop.f32.mrf.mxu0 }
 0x2da   : > { %v871_v15 = vsel %vm870_vm4, %v869_v13, -inf  ;;  %v1714_v14 = vld [vmem:[%s2113_s10] sm:$0xff]  }
 0x2db   : > { %872 = vmax.xlane.f32.xlu0 %v871_v15  ;;  %v1593_v16 = vpop.f32.mrf.mxu0 }
 0x348   : > { %v976_v17 = vpop.f32.mrf.mxu0 }
 0x349   : > { %v982_v18 = vmul.f32 0.25, %v976_v17 }
 0x34a   : > { %v1604_v19 = vpop.f32.mrf.mxu0 }
 0x34b   : > { %v983_v20 = vadd.f32 %v1498_v10, %v982_v18  ;;  %v1710_v10 = vld [vmem:[%s2113_s10 + $0x20] sm:$0xff]  }
 0x34c   : > { %v979_v21 = vpop.f32.mrf.mxu0  ;;  %v1506_v19 = vld [vmem:[%s2111_s8] ss:$0 sm:$0xff] }
 0x34d   : > { %v984_v22 = vsel %vm870_vm4, %v983_v20, -inf  ;;  %v1507_v21 = vld [vmem:[%s2112_s9] ss:$0 sm:$0xff] }
 0x34e   : > { %985 = vmax.xlane.f32.xlu1 %v984_v22  ;;  %v1605_v23 = vpop.f32.mrf.mxu0 }
 0x364   : > { %v873_v24 = vpop.xlane.xlu0 %872 }
 0x365   : > { %v874_v25 = vsub.f32 %v869_v13, %v873_v24  ;;  %v1713_v13 = vld [vmem:[%s2113_s10 + $0x8] sm:$0xff]  }
 0x367   : > { %v875_v26 = vmul.f32 1.442695, %v874_v25  ;;  %v1715_v25 = vld [vmem:[%s2115_s12 + $0x38] sm:$0xff]  }
 0x369   : > { %1725 = vpow2.f32 %v875_v26  ;;  %v1716_v26 = vld [vmem:[%s2115_s12 + $0x30] sm:$0xff]  }
 0x376   : > { %v1726_v27 = vpop.eup %1725 }
 0x377   : > { %v877_v28 = vsel %vm870_vm4, %v1726_v27, 0.0 }
 0x378   : > { %878 = vadd.xlane.f32.xlu0 %v877_v28  ;;  %v1718_v28 = vld [vmem:[%s2115_s12 + $0x20] sm:$0xff]  }
 0x3d7   : > { %v986_v29 = vpop.xlane.xlu1 %985 }
 0x3d8   : > { %v987_v30 = vsub.f32 %v983_v20, %v986_v29  ;;  %v1719_v29 = vld [vmem:[%s2115_s12 + $0x18] sm:$0xff]  }
 0x3da   : > { %v988_v31 = vmul.f32 1.442695, %v987_v30  ;;  %v1720_v30 = vld [vmem:[%s2115_s12 + $0x10] sm:$0xff]  }
 0x3dc   : > { %1727 = vpow2.f32 %v988_v31  ;;  %v1721_v31 = vld [vmem:[%s2115_s12 + $0x8] sm:$0xff]  }
 0x3e9   : > { %v1728_v32 = vpop.eup %1727 }
 0x3ea   : > { %v990_v33 = vsel %vm870_vm4, %v1728_v32, 0.0 }
 0x3eb   : > { %991 = vadd.xlane.f32.xlu0 %v990_v33  ;;  %v1508_v33 = vld [vmem:[%s2114_s11] ss:$0 sm:$0xff] }
 0x401   : > { %v879_v34 = vpop.xlane.xlu0 %878  ;;  %997 = vrot.lane.b32.xlu0 %v816_v57, %s1750_s28 }
 0x402   : > { %1729 = vrcp.f32 %v879_v34 }
 0x40f   : > { %v1730_v35 = vpop.eup %1729 }
 0x410   : > { %v881_v36 = vmul.f32 %v1730_v35, %v1726_v27  ;;  %v1717_v27 = vld [vmem:[%s2115_s12 + $0x28] sm:$0xff]  }
 0x412   : > { %v882_v37 = vpack.c.bf16 %v881_v36, %v881_v36 }
 0x414   : > { %1597 = vmatmul.mubr.msk.bf16.vlgmr.msra.gmra.mxu1 %vm870_vm4, %v882_v37 }
 0x415   : > { %1608 = vmatprep.mubr.msk.bf16.mxu1 %vm1749_vm1, %v1747_v3 }
 0x474   : > { %v992_v38 = vpop.xlane.xlu0 %991 }
 0x475   : > { %1731 = vrcp.f32 %v992_v38 }
 0x478   : > { %v998_v39 = vpop.permute.xlu0 %997 }
 0x479   : > { %v1003_v40 = vsel %vm886_vm2, %v998_v39, 0 }
 0x47a   : > { %1607 = vmatpush3.bf16.msra.mxu1 %v1003_v40 }
 0x47b   : > { %1620 = vmatprep.subr.bf16.mxu1 %v1747_v3 }
 0x482   : > { %v1732_v41 = vpop.eup %1731 }
 0x483   : > { %v994_v43 = vmul.f32 %v1732_v41, %v1728_v32  ;;  %v1722_v32 = vld [vmem:[%s2115_s12] sm:$0xff]  }
 0x485   : > { %v995_v44 = vpack.c.bf16 %v994_v43, %v994_v43 }
 0x487   : > { %1609 = vmatmul.mubr.msk.bf16.vlgmr.msra.gmra.mxu1 %vm870_vm4, %v995_v44 }
 0x488   : > { %1636 = vmatprep.mubr.msk.bf16.mxu1 %vm1749_vm1, %v1747_v3  ;;  %1621 = vmatpush3.bf16.msra.mxu1 %v1707_v1  ;;  %v1526_v1 = vld [vmem:[%s2117_s14] ss:$0 sm:$0xff] }
 0x489   : > { %1622 = vmatprep.subr.bf16.mxu1 %v1747_v3 }
 0x48c   : > { %1623 = vmatpush3.bf16.msra.mxu1 %v1708_v2 }
 0x48d   : > { %1624 = vmatprep.subr.bf16.mxu1 %v1747_v3 }
 0x490   : > { %1625 = vmatpush3.bf16.msra.mxu1 %v1709_v8 }
 0x491   : > { %1626 = vmatprep.subr.bf16.mxu1 %v1747_v3 }
 0x494   : > { %1627 = vmatpush3.bf16.msra.mxu1 %v1710_v10 }
 0x495   : > { %1628 = vmatprep.subr.bf16.mxu1 %v1747_v3 }
 0x498   : > { %1629 = vmatpush3.bf16.msra.mxu1 %v1711_v11 }
 0x499   : > { %1630 = vmatprep.subr.bf16.mxu1 %v1747_v3 }
 0x49c   : > { %1631 = vmatpush3.bf16.msra.mxu1 %v1712_v12 }
 0x49d   : > { %1632 = vmatprep.subr.bf16.mxu1 %v1747_v3 }
 0x4a0   : > { %1633 = vmatpush3.bf16.msra.mxu1 %v1713_v13 }
 0x4a1   : > { %1634 = vmatprep.subr.bf16.mxu1 %v1747_v3 }
 0x4a4   : > { %1635 = vmatpush3.bf16.msra.mxu1 %v1714_v14 }
 0x4d4   : > { %v924_v46 = vpop.f32.mrf.mxu1 }
 0x4d6   : > { %v1598_v47 = vpop.f32.mrf.mxu1 }
 0x4d8   : > { %v927_v48 = vpop.f32.mrf.mxu1 }
 0x4da   : > { %v1599_v49 = vpop.f32.mrf.mxu1 }
 0x4db   : > { %v1517_v49 = vld [vmem:[%s2116_s13] ss:$0 sm:$0xff] }
 0x547   : > { %v1039_v51 = vpop.f32.mrf.mxu1 }
 0x548   : > { %1046 = vrot.lane.b32.xlu0 %v1039_v51, %s1751_s20 }
 0x549   : > { %v1610_v52 = vpop.f32.mrf.mxu1 }
 0x54b   : > { %v1042_v53 = vpop.f32.mrf.mxu1 }
 0x54d   : > { %v1611_v54 = vpop.f32.mrf.mxu1 }
 0x5ba   : > { %v1047_v55 = vpop.permute.xlu0 %1046 }
 0x5bb   : > { %v1049_v56 = vsel %vm817_vm3, %v924_v46, %v1047_v55 }
 0x5bc   : > { %v1050_v57 = vpack.c.bf16 %v1049_v56, %v1049_v56 }
 0x5be   : > { %1617 = vmatmul.mubr.msk.bf16.vlgmr.msra.gmra.mxu0 %vm1074_vm5, %v1050_v57 }
 0x5bf   : > { %1656 = vmatprep.mubr.msk.bf16.mxu0 %vm1749_vm1, %v1747_v3  ;;  %1641 = vmatpush3.bf16.msra.mxu0 %v1715_v25 }
 0x5c0   : > { %1642 = vmatprep.subr.bf16.mxu0 %v1747_v3 }
 0x5c3   : > { %1643 = vmatpush3.bf16.msra.mxu0 %v1716_v26 }
 0x5c4   : > { %1644 = vmatprep.subr.bf16.mxu0 %v1747_v3 }
 0x5c7   : > { %1645 = vmatpush3.bf16.msra.mxu0 %v1717_v27 }
 0x5c8   : > { %1646 = vmatprep.subr.bf16.mxu0 %v1747_v3 }
 0x5cb   : > { %1647 = vmatpush3.bf16.msra.mxu0 %v1718_v28 }
 0x5cc   : > { %1648 = vmatprep.subr.bf16.mxu0 %v1747_v3 }
 0x5cf   : > { %1649 = vmatpush3.bf16.msra.mxu0 %v1719_v29 }
 0x5d0   : > { %1650 = vmatprep.subr.bf16.mxu0 %v1747_v3 }
 0x5d3   : > { %1651 = vmatpush3.bf16.msra.mxu0 %v1720_v30 }
 0x5d4   : > { %1652 = vmatprep.subr.bf16.mxu0 %v1747_v3 }
 0x5d7   : > { %1653 = vmatpush3.bf16.msra.mxu0 %v1721_v31 }
 0x5d8   : > { %1654 = vmatprep.subr.bf16.mxu0 %v1747_v3 }
 0x5db   : > { %1655 = vmatpush3.bf16.msra.mxu0 %v1722_v32 }
 0x67e   : > { %v1112_v59 = vpop.f32.mrf.mxu0 }
 0x67f   : > { %v1113_v60 = vadd.f32 %v1502_v58, %v1112_v59 }
 0x680   : > { %v1618_v61 = vpop.f32.mrf.mxu0 }
 0x681   : > { %v1118_v62 = vadd.f32 %v1113_v60, %v1953_v42 }
 0x682   : > { %v1115_v63 = vpop.f32.mrf.mxu0 }
 0x683   : > { %1121 = vadd.xlane.f32.xlu1 %v1118_v62 }
 0x684   : > { %v1619_v0 = vpop.f32.mrf.mxu0 }
 0x70c   : > { %v1122_v4 = vpop.xlane.xlu1 %1121 }
 0x70d   : > { %v1123_v5 = vmul.f32 0.03125, %v1122_v4  ;;  %v1527_v4 = vld [vmem:[%s2118_s15] ss:$0 sm:$0xff] }
 0x70f   : > { %v1124_v42 = vsub.f32 %v1118_v62, %v1123_v5 }
 0x711   : > { %v1125_v6 = vsel %vm521_vm0, %v1124_v42, 0.0 }
 0x712   : > { %v1126_v7 = vmul.f32 %v1125_v6, %v1125_v6 }
 0x714   : > { %1127 = vadd.xlane.f32.xlu0 %v1126_v7 }
 0x79d   : > { %v1128_v15 = vpop.xlane.xlu0 %1127 }
 0x79e   : > { %v1129_v16 = vmul.f32 0.03125, %v1128_v15 }
 0x7a0   : > { %v1130_v17 = vadd.f32 1e-12, %v1129_v16 }
 0x7a2   : > { %1733 = vrsqrt.f32 %v1130_v17 }
 0x7af   : > { %v1734_v18 = vpop.eup %1733 }
 0x7b0   : > { %v1132_v20 = vmul.f32 %v1734_v18, %v1125_v6 }
 0x7b2   : > { %v1139_v22 = vmul.f32 %v1506_v19, %v1132_v20 }
 0x7b4   : > { %v1146_v23 = vadd.f32 %v1507_v21, %v1139_v22 }
 0x7b6   : > { %v1147_v24 = vpack.c.bf16 %v1146_v23, %v1146_v23 }
 0x7b8   : > { %1637 = vmatmul.mubr.bf16.vlgmr.msra.gmra.mxu1 %v1147_v24 }
 0x878   : > { %v1253_v34 = vpop.f32.mrf.mxu1 }
 0x879   : > { %v1254_v35 = vadd.f32 %v1508_v33, %v1253_v34 }
 0x87a   : > { %v1638_v36 = vpop.f32.mrf.mxu1 }
 0x87b   : > { %v1260_v37 = vmul.f32 0.044715, %v1254_v35  ;;  %v1259_v46 = vmul.f32 0.5, %v1254_v35 }
 0x87c   : > { %v1256_v38 = vpop.f32.mrf.mxu1 }
 0x87d   : > { %v1261_v39 = vmul.f32 %v1260_v37, %v1254_v35 }
 0x87e   : > { %v1639_v40 = vpop.f32.mrf.mxu1 }
 0x87f   : > { %v1262_v41 = vmul.f32 %v1261_v39, %v1254_v35 }
 0x881   : > { %v1263_v43 = vadd.f32 %v1262_v41, %v1254_v35 }
 0x883   : > { %v1264_v44 = vmul.f32 0.7978846, %v1263_v43 }
 0x885   : > { %1735 = vtanh.f32 %v1264_v44 }
 0x892   : > { %v1736_v45 = vpop.eup %1735 }
 0x893   : > { %v1266_v47 = vadd.f32 1.0, %v1736_v45 }
 0x895   : > { %v1267_v3 = vmul.f32 %v1266_v47, %v1259_v46 }
 0x897   : > { %v1268_v48 = vpack.c.bf16 %v1267_v3, %v1267_v3 }
 0x899   : > { %1657 = vmatmul.mubr.bf16.vlgmr.msra.gmra.mxu0 %v1268_v48 }
 0x959   : > { %v1374_v50 = vpop.f32.mrf.mxu0 }
 0x95a   : > { %v1375_v51 = vadd.f32 %v1517_v49, %v1374_v50 }
 0x95b   : > { %v1658_v52 = vpop.f32.mrf.mxu0 }
 0x95c   : > { %v1380_v53 = vadd.f32 %v1375_v51, %v1146_v23 }
 0x95d   : > { %v1377_v54 = vpop.f32.mrf.mxu0 }
 0x95e   : > { %1383 = vadd.xlane.f32.xlu1 %v1380_v53 }
 0x95f   : > { %v1659_v55 = vpop.f32.mrf.mxu0 }
 0x9e7   : > { %v1384_v56 = vpop.xlane.xlu1 %1383 }
 0x9e8   : > { %v1385_v57 = vmul.f32 0.03125, %v1384_v56 }
 0x9ea   : > { %v1386_v58 = vsub.f32 %v1380_v53, %v1385_v57 }
 0x9ec   : > { %v1387_v59 = vsel %vm521_vm0, %v1386_v58, 0.0 }
 0x9ed   : > { %v1388_v60 = vmul.f32 %v1387_v59, %v1387_v59 }
 0x9ef   : > { %1389 = vadd.xlane.f32.xlu1 %v1388_v60 }
 0xa78   : > { %v1390_v61 = vpop.xlane.xlu1 %1389 }
 0xa79   : > { %v1391_v62 = vmul.f32 0.03125, %v1390_v61 }
 0xa7b   : > { %v1392_v63 = vadd.f32 1e-12, %v1391_v62 }
 0xa7d   : > { %1737 = vrsqrt.f32 %v1392_v63 }
 0xa8a   : > { %v1738_v0 = vpop.eup %1737 }
 0xa8b   : > { %v1394_v2 = vmul.f32 %v1738_v0, %v1387_v59 }
 0xa8d   : > { %v1401_v5 = vmul.f32 %v1526_v1, %v1394_v2 }
 0xa8f   : > { %v1408_v9 = vadd.f32 %v1527_v4, %v1401_v5 }
 0xa91   : > { %1409 = vst [vmem:[%s516_s25] sm:$0xff] %v1408_v9 }
 0xa92 PF: > { %s26_s21 = sadd.s32 1, %s1745_s21  }
 0xa93   : > { %p23_p4 = scmp.ge.s32.totalorder %s26_s21, 4  }
 0xa95   :  { %25 = sbr.rel (!%p23_p4) target bundleno = 2 (0x2), region = 115 }

</bundles_post_ra>
